<compile_context>
chip_gen: v5e
topology: v5e:2x2
jax: 0.10.0
libtpu: 0.0.40
codegen_flags: <defaults>
</compile_context>

<pallas_src>
import functools

import jax
import jax.numpy as jnp
from jax.experimental import pallas as pl
from jax.experimental.pallas import tpu as pltpu

LANE = 128


def _round_up(x, m):
    return (x + m - 1) // m * m


def _device_has_bf16_vpu():
    """bf16 SiLU epilogue only where the VPU/EUP are bf16-capable (v6e/v7x)."""
    try:
        kind = jax.devices()[0].device_kind.lower()
    except Exception:  # pragma: no cover - be conservative
        return False
    return any(tag in kind for tag in ("v6", "v7", "7x", "trillium"))


# ----------------------------- fused Pallas kernel ---------------------------
#
# Spatial indexing trick: the padded input is 2x2 space-to-depth'd into "cells"
# xs[n, i*(Wo+1)+j, (p*2+q)*cin + c] = x_pad[n, 2i+p, 2j+q, c].  The 3x3/s2
# conv then becomes a 2x2/s1 conv over cells: for shift (a, b) in {0,1}^2 the
# needed cells of ALL extended output positions r = oh*(Wo+1)+ow (one junk
# column ow == Wo per row keeps the window contiguous) form the contiguous row
# window xs[:, a*(Wo+1)+b : ... + rows, :].  Junk columns / alignment rows are
# removed by the pool mask and never stored.

def _fused_forward_kernel(xs_ref, stem_w_ref, pw_w_ref, cls_w_ref,
                          bias_ref, mask_ref, logits_ref, pooled_ref,
                          *, bn, rows, row_stride, epi_dtype):
    c4 = xs_ref.shape[-1]

    def tap(off):
        # Shifted (bn, rows, 4*cin) cell window, flattened to a 2-D matmul LHS
        # (contiguous leading-dim merge; rows is 16-aligned for bf16 packing).
        return xs_ref[:, pl.ds(off, rows), :].reshape(bn * rows, c4)

    # --- stem 3x3/s2 conv: 4 shifted matmuls, BN scale folded into weights ---
    offs = (0, 1, row_stride, row_stride + 1)
    h = jnp.dot(tap(offs[0]), stem_w_ref[0],
                preferred_element_type=jnp.float32)
    for ab in range(1, 4):
        h = h + jnp.dot(tap(offs[ab]), stem_w_ref[ab],
                        preferred_element_type=jnp.float32)
    h = (h + bias_ref[0:1, :]).astype(epi_dtype)
    h = h * jax.nn.sigmoid(h)                                   # SiLU

    # --- 1x1 conv (+ folded BN) + SiLU; intermediate stays in VMEM -----------
    h2 = jnp.dot(h.astype(jnp.bfloat16), pw_w_ref[...],
                 preferred_element_type=jnp.float32)
    h2 = (h2 + bias_ref[1:2, :]).astype(epi_dtype)
    h2 = h2 * jax.nn.sigmoid(h2)

    # --- global average pool: mask folds junk/pad rows and the 1/HW divisor --
    h2 = h2.astype(jnp.float32).reshape(bn, rows, -1)
    pooled = jnp.sum(h2 * mask_ref[...], axis=1)                # (bn, C2P) f32
    pooled_ref[...] = pooled

    # --- classifier (Dropout is identity at inference) ------------------------
    logits_ref[...] = (jnp.dot(pooled.astype(jnp.bfloat16), cls_w_ref[...],
                               preferred_element_type=jnp.float32)
                       + bias_ref[2:3, :])


def _fused_forward_call(xs, stem_wsd, pw_w, cls_w, biases, pool_mask,
                        *, bn, rows, row_stride, epi_dtype):
    n_pad, r0, c4 = xs.shape
    kernel = functools.partial(_fused_forward_kernel, bn=bn, rows=rows,
                               row_stride=row_stride, epi_dtype=epi_dtype)

    logits_p, pooled_p = pl.pallas_call(
        kernel,
        out_shape=(
            jax.ShapeDtypeStruct((n_pad, LANE), jnp.float32),   # logits (padded)
            jax.ShapeDtypeStruct((n_pad, LANE), jnp.float32),   # pooled (padded)
        ),
        grid_spec=pltpu.PrefetchScalarGridSpec(
            num_scalar_prefetch=0,
            grid=(n_pad // bn,),
            in_specs=[
                pl.BlockSpec((bn, r0, c4), lambda i: (i, 0, 0)),   # xs cells
                pl.BlockSpec((4, c4, LANE), lambda i: (0, 0, 0)),  # stem W (sd)
                pl.BlockSpec((LANE, LANE), lambda i: (0, 0)),      # pw W
                pl.BlockSpec((LANE, LANE), lambda i: (0, 0)),      # cls W
                pl.BlockSpec((3, LANE), lambda i: (0, 0)),         # packed biases
                pl.BlockSpec((rows, 1), lambda i: (0, 0)),         # pool mask
            ],
            out_specs=(
                pl.BlockSpec((bn, LANE), lambda i: (i, 0)),
                pl.BlockSpec((bn, LANE), lambda i: (i, 0)),
            ),
        ),
        compiler_params=pltpu.CompilerParams(
            dimension_semantics=("parallel",),
            vmem_limit_bytes=32 * 1024 * 1024),
    )(xs, stem_wsd, pw_w, cls_w, biases, pool_mask)
    return logits_p, pooled_p


# ------------------------------ host-side prep -------------------------------

def _space_to_depth_cells(x_nhwc, r0):
    """pad=1, then 2x2 space-to-depth; flatten cells row-major (pure layout)."""
    n, h, w, c = x_nhwc.shape
    ho, wo = h // 2, w // 2
    xp = jnp.pad(x_nhwc, ((0, 0), (1, 1), (1, 1), (0, 0)))       # (N, H+2, W+2, C)
    xs = xp.reshape(n, ho + 1, 2, wo + 1, 2, c).transpose(0, 1, 3, 2, 4, 5)
    xs = xs.reshape(n, (ho + 1) * (wo + 1), 4 * c)
    ncell = (ho + 1) * (wo + 1)
    xs = jnp.pad(xs, ((0, 0), (0, r0 - ncell), (0, 0)))          # zero pad rows
    return xs.astype(jnp.bfloat16)


def _build_stem_wsd(stem_w, stem_scale, cin):
    """Rearrange the (9*cin, c1) stem weight (BN scale folded) into the four
    (4*cin, 128) space-to-depth shift slices used by the kernel."""
    c1 = stem_w.shape[1]
    w = (stem_w.astype(jnp.float32) * stem_scale.astype(jnp.float32)[None, :]
         ).reshape(3, 3, cin, c1)
    wsd = jnp.zeros((4, 4 * cin, LANE), jnp.float32)
    for di in range(3):
        for dj in range(3):
            a, p = (1, 0) if di == 2 else (0, di)
            b, q = (1, 0) if dj == 2 else (0, dj)
            row0 = (p * 2 + q) * cin
            wsd = wsd.at[a * 2 + b, row0:row0 + cin, :c1].set(w[di, dj])
    return wsd.astype(jnp.bfloat16)


def feature_extractor_wrapper_forward(x_nchw, params, *, batch_block=None,
                                      bf16_epilogue=None):
    """Matches FeatureExtractorWrapper.forward: returns (logits, pooled_features)."""
    x = jnp.transpose(x_nchw, (0, 2, 3, 1)).astype(jnp.float32)   # NCHW -> NHWC
    n, h, w, cin = x.shape
    assert h % 2 == 0 and w % 2 == 0, "toy stem assumes even spatial dims"
    ho, wo = h // 2, w // 2
    hw = ho * wo
    row_stride = wo + 1                       # one junk column per output row
    r_ext = ho * row_stride                   # extended output positions
    rows = _round_up(r_ext, 16)               # 16-aligned for bf16 sublane tiles
    r0 = _round_up(rows + row_stride + 1, 16)  # cells needed by the last shift

    c1 = params["stem_scale"].shape[0]
    c2 = params["pw_scale"].shape[0]
    nc = params["cls_b"].shape[0]
    assert max(c1, c2, nc, 4 * cin) <= LANE, "toy stack: one 128-lane tile"

    # Batch blocking (review: block by 8 when N >= 8; otherwise one full block).
    if batch_block is None:
        bn = 8 if n >= 8 else n
    else:
        bn = max(1, min(batch_block, n))
    if bn % 8 != 0:
        bn = n                                 # sub-8 blocks only as full extent
    n_pad = _round_up(n, bn)

    if bf16_epilogue is None:
        bf16_epilogue = _device_has_bf16_vpu()
    epi_dtype = jnp.bfloat16 if bf16_epilogue else jnp.float32

    # Space-to-depth input cells (bf16, ~1x input bytes; no im2col tensor).
    xs = _space_to_depth_cells(x, r0)
    if n_pad != n:
        xs = jnp.pad(xs, ((0, n_pad - n), (0, 0), (0, 0)))

    # Weights: BN scales folded, zero-padded to 128 lanes, bf16 on the MXU.
    stem_wsd = _build_stem_wsd(params["stem_w"], params["stem_scale"], cin)
    pw_w = jnp.zeros((LANE, LANE), jnp.float32).at[:c1, :c2].set(
        params["pw_w"].astype(jnp.float32)
        * params["pw_scale"].astype(jnp.float32)[None, :]).astype(jnp.bfloat16)
    cls_w = jnp.zeros((LANE, LANE), jnp.float32).at[:c2, :nc].set(
        params["cls_w"].astype(jnp.float32)).astype(jnp.bfloat16)

    # Packed biases: rows = [stem_bias, pw_bias, cls_bias], padded lanes stay 0
    # so padded channels remain exactly zero through SiLU / pool / classifier.
    biases = (jnp.zeros((3, LANE), jnp.float32)
              .at[0, :c1].set(params["stem_bias"].astype(jnp.float32))
              .at[1, :c2].set(params["pw_bias"].astype(jnp.float32))
              .at[2, :nc].set(params["cls_b"].astype(jnp.float32)))

    # Pool mask: 1/HW on real positions, 0 on junk columns / alignment rows
    # (those rows are SiLU(bias) != 0 and must not bias the average).
    r_idx = jnp.arange(rows)
    real = (r_idx % row_stride < wo) & (r_idx // row_stride < ho)
    pool_mask = jnp.where(real, 1.0 / hw, 0.0).astype(jnp.float32).reshape(rows, 1)

    logits_p, pooled_p = _fused_forward_call(
        xs, stem_wsd, pw_w, cls_w, biases, pool_mask,
        bn=bn, rows=rows, row_stride=row_stride, epi_dtype=epi_dtype)

    # Slice padded batch / lane dims back to the true widths.
    logits = logits_p[:n, :nc]
    pooled_features = pooled_p[:n, :c2]
    return logits, pooled_features


# ------------------------------ pure-JAX reference ---------------------------

def _im2col(x_nhwc, kh, kw, pad, stride):
    """Reference-only patch extraction (NOT used by the kernel path)."""
    n, h, w, c = x_nhwc.shape
    ho = (h + 2 * pad - kh) // stride + 1
    wo = (w + 2 * pad - kw) // stride + 1
    xp = jnp.pad(x_nhwc, ((0, 0), (pad, pad), (pad, pad), (0, 0)))
    cols = []
    for i in range(kh):
        for j in range(kw):
            cols.append(xp[:, i:i + stride * ho:stride,
                             j:j + stride * wo:stride, :])
    patches = jnp.concatenate(cols, axis=-1)
    return patches.reshape(n, ho * wo, kh * kw * c), (n, ho, wo)


def _reference_forward(x_nchw, params):
    """Pure-JAX f32 reference for correctness checking."""
    x = jnp.transpose(x_nchw, (0, 2, 3, 1)).astype(jnp.float32)
    patches, (n, ho, wo) = _im2col(x, kh=3, kw=3, pad=1, stride=2)
    h = patches.reshape(n * ho * wo, -1) @ params["stem_w"]
    h = h * params["stem_scale"] + params["stem_bias"]
    h = h * jax.nn.sigmoid(h)
    h = h @ params["pw_w"]
    h = h * params["pw_scale"] + params["pw_bias"]
    h = h * jax.nn.sigmoid(h)
    c2 = params["pw_w"].shape[1]
    feat = h.reshape(n, ho * wo, c2)
    pooled = feat.mean(axis=1)
    logits = pooled @ params["cls_w"] + params["cls_b"]
    return logits, pooled


def init_params(key, cin=4, c1=16, c2=32, num_classes=10):
    """Deterministic synthetic parameters (BN folded into scale/bias)."""
    ks = jax.random.split(key, 8)
    return {
        "stem_w": jax.random.normal(ks[0], (3 * 3 * cin, c1), jnp.float32) * 0.1,
        "stem_scale": 1.0 + 0.05 * jax.random.normal(ks[1], (c1,), jnp.float32),
        "stem_bias": 0.05 * jax.random.normal(ks[2], (c1,), jnp.float32),
        "pw_w": jax.random.normal(ks[3], (c1, c2), jnp.float32) * 0.1,
        "pw_scale": 1.0 + 0.05 * jax.random.normal(ks[4], (c2,), jnp.float32),
        "pw_bias": 0.05 * jax.random.normal(ks[5], (c2,), jnp.float32),
        "cls_w": jax.random.normal(ks[6], (c2, num_classes), jnp.float32) * 0.1,
        "cls_b": 0.01 * jax.random.normal(ks[7], (num_classes,), jnp.float32),
    }


if __name__ == "__main__":
    key = jax.random.PRNGKey(0)
    kx, kp = jax.random.split(key)

    # Small shapes consistent with the module's NCHW conv input.
    x = jax.random.normal(kx, (2, 4, 16, 16), jnp.float32)
    params = init_params(kp, cin=4, c1=16, c2=32, num_classes=10)

    fwd = jax.jit(functools.partial(feature_extractor_wrapper_forward,
                                    params=params))
    logits, pooled = fwd(x)
    jax.block_until_ready((logits, pooled))

    assert logits.shape == (2, 10), logits.shape
    assert pooled.shape == (2, 32), pooled.shape
    assert logits.dtype == jnp.float32 and pooled.dtype == jnp.float32

    ref_logits, ref_pooled = _reference_forward(x, params)
    assert jnp.allclose(logits, ref_logits, atol=3e-2, rtol=3e-2), (
        float(jnp.max(jnp.abs(logits - ref_logits))))
    assert jnp.allclose(pooled, ref_pooled, atol=3e-2, rtol=3e-2), (
        float(jnp.max(jnp.abs(pooled - ref_pooled))))

    # Also exercise the batch-blocked multi-step grid path (bn=8, batch
    # padding 10 -> 16, grid=(2,), unmasked (8,128) stores).
    x2 = jax.random.normal(jax.random.fold_in(kx, 1), (10, 4, 16, 16),
                           jnp.float32)
    logits2, pooled2 = jax.jit(functools.partial(
        feature_extractor_wrapper_forward, params=params))(x2)
    jax.block_until_ready((logits2, pooled2))
    assert logits2.shape == (10, 10) and pooled2.shape == (10, 32)
    ref_logits2, ref_pooled2 = _reference_forward(x2, params)
    assert jnp.allclose(logits2, ref_logits2, atol=3e-2, rtol=3e-2), (
        float(jnp.max(jnp.abs(logits2 - ref_logits2))))
    assert jnp.allclose(pooled2, ref_pooled2, atol=3e-2, rtol=3e-2), (
        float(jnp.max(jnp.abs(pooled2 - ref_pooled2))))

    print("KERNEL_OK")
</pallas_src>

<mosaic_0001>
module attributes {stable_mosaic.version = 11 : i64} {
  func.func @_fused_forward_kernel(%arg0: i32, %arg1: memref<2x96x16xbf16, #tpu.memory_space<vmem>>, %arg2: memref<4x16x128xbf16, #tpu.memory_space<vmem>>, %arg3: memref<128x128xbf16, #tpu.memory_space<vmem>>, %arg4: memref<128x128xbf16, #tpu.memory_space<vmem>>, %arg5: memref<3x128xf32, #tpu.memory_space<vmem>>, %arg6: memref<80x1xf32, #tpu.memory_space<vmem>>, %arg7: memref<2x128xf32, #tpu.memory_space<vmem>>, %arg8: memref<2x128xf32, #tpu.memory_space<vmem>>) attributes {dimension_semantics = [#tpu.dimension_semantics<parallel>], iteration_bounds = array<i64: 1>, scalar_prefetch = 0 : i64, scratch_operands = 0 : i64, tpu.core_type = #tpu.core_type<tc>, window_params = [{transform_indices = @transform_0, window_bounds = array<i64: 2, 96, 16>}, {pipeline_mode = #tpu.pipeline_mode<synchronous>, transform_indices = @transform_1, window_bounds = array<i64: 4, 16, 128>}, {pipeline_mode = #tpu.pipeline_mode<synchronous>, transform_indices = @transform_2, window_bounds = array<i64: 128, 128>}, {pipeline_mode = #tpu.pipeline_mode<synchronous>, transform_indices = @transform_3, window_bounds = array<i64: 128, 128>}, {pipeline_mode = #tpu.pipeline_mode<synchronous>, transform_indices = @transform_4, window_bounds = array<i64: 3, 128>}, {pipeline_mode = #tpu.pipeline_mode<synchronous>, transform_indices = @transform_5, window_bounds = array<i64: 80, 1>}, {transform_indices = @transform_6, window_bounds = array<i64: 2, 128>}, {transform_indices = @transform_7, window_bounds = array<i64: 2, 128>}]} {
    %c0 = arith.constant 0 : index
    %c0_0 = arith.constant 0 : index
    %c0_1 = arith.constant 0 : index
    %0 = vector.load %arg1[%c0, %c0_0, %c0_1] : memref<2x96x16xbf16, #tpu.memory_space<vmem>>, vector<2x80x16xbf16>
    %1 = vector.shape_cast %0 : vector<2x80x16xbf16> to vector<160x16xbf16>
    %c0_2 = arith.constant 0 : index
    %c0_3 = arith.constant 0 : index
    %c0_4 = arith.constant 0 : index
    %2 = vector.load %arg2[%c0_2, %c0_3, %c0_4] : memref<4x16x128xbf16, #tpu.memory_space<vmem>>, vector<1x16x128xbf16>
    %3 = vector.shape_cast %2 : vector<1x16x128xbf16> to vector<16x128xbf16>
    %cst = arith.constant dense<0.000000e+00> : vector<160x128xf32>
    %4 = tpu.matmul %1, %3, %cst {dimension_numbers = #tpu.dot_dimension_numbers<[1], [0], [0], [1], [0, 0, 1, 1], [], []>} : vector<160x16xbf16>, vector<16x128xbf16>, vector<160x128xf32> -> vector<160x128xf32>
    %c0_5 = arith.constant 0 : index
    %c1 = arith.constant 1 : index
    %c0_6 = arith.constant 0 : index
    %5 = vector.load %arg1[%c0_5, %c1, %c0_6] : memref<2x96x16xbf16, #tpu.memory_space<vmem>>, vector<2x80x16xbf16>
    %6 = vector.shape_cast %5 : vector<2x80x16xbf16> to vector<160x16xbf16>
    %c1_7 = arith.constant 1 : index
    %c0_8 = arith.constant 0 : index
    %c0_9 = arith.constant 0 : index
    %7 = vector.load %arg2[%c1_7, %c0_8, %c0_9] : memref<4x16x128xbf16, #tpu.memory_space<vmem>>, vector<1x16x128xbf16>
    %8 = vector.shape_cast %7 : vector<1x16x128xbf16> to vector<16x128xbf16>
    %cst_10 = arith.constant dense<0.000000e+00> : vector<160x128xf32>
    %9 = tpu.matmul %6, %8, %cst_10 {dimension_numbers = #tpu.dot_dimension_numbers<[1], [0], [0], [1], [0, 0, 1, 1], [], []>} : vector<160x16xbf16>, vector<16x128xbf16>, vector<160x128xf32> -> vector<160x128xf32>
    %10 = arith.addf %4, %9 : vector<160x128xf32>
    %c0_11 = arith.constant 0 : index
    %c9 = arith.constant 9 : index
    %c0_12 = arith.constant 0 : index
    %11 = vector.load %arg1[%c0_11, %c9, %c0_12] : memref<2x96x16xbf16, #tpu.memory_space<vmem>>, vector<2x80x16xbf16>
    %12 = vector.shape_cast %11 : vector<2x80x16xbf16> to vector<160x16xbf16>
    %c2 = arith.constant 2 : index
    %c0_13 = arith.constant 0 : index
    %c0_14 = arith.constant 0 : index
    %13 = vector.load %arg2[%c2, %c0_13, %c0_14] : memref<4x16x128xbf16, #tpu.memory_space<vmem>>, vector<1x16x128xbf16>
    %14 = vector.shape_cast %13 : vector<1x16x128xbf16> to vector<16x128xbf16>
    %cst_15 = arith.constant dense<0.000000e+00> : vector<160x128xf32>
    %15 = tpu.matmul %12, %14, %cst_15 {dimension_numbers = #tpu.dot_dimension_numbers<[1], [0], [0], [1], [0, 0, 1, 1], [], []>} : vector<160x16xbf16>, vector<16x128xbf16>, vector<160x128xf32> -> vector<160x128xf32>
    %16 = arith.addf %10, %15 : vector<160x128xf32>
    %c0_16 = arith.constant 0 : index
    %c10 = arith.constant 10 : index
    %c0_17 = arith.constant 0 : index
    %17 = vector.load %arg1[%c0_16, %c10, %c0_17] : memref<2x96x16xbf16, #tpu.memory_space<vmem>>, vector<2x80x16xbf16>
    %18 = vector.shape_cast %17 : vector<2x80x16xbf16> to vector<160x16xbf16>
    %c3 = arith.constant 3 : index
    %c0_18 = arith.constant 0 : index
    %c0_19 = arith.constant 0 : index
    %19 = vector.load %arg2[%c3, %c0_18, %c0_19] : memref<4x16x128xbf16, #tpu.memory_space<vmem>>, vector<1x16x128xbf16>
    %20 = vector.shape_cast %19 : vector<1x16x128xbf16> to vector<16x128xbf16>
    %cst_20 = arith.constant dense<0.000000e+00> : vector<160x128xf32>
    %21 = tpu.matmul %18, %20, %cst_20 {dimension_numbers = #tpu.dot_dimension_numbers<[1], [0], [0], [1], [0, 0, 1, 1], [], []>} : vector<160x16xbf16>, vector<16x128xbf16>, vector<160x128xf32> -> vector<160x128xf32>
    %22 = arith.addf %16, %21 : vector<160x128xf32>
    %c0_21 = arith.constant 0 : index
    %c0_22 = arith.constant 0 : index
    %23 = vector.load %arg5[%c0_21, %c0_22] : memref<3x128xf32, #tpu.memory_space<vmem>>, vector<1x128xf32>
    %24 = vector.broadcast %23 : vector<1x128xf32> to vector<160x128xf32>
    %25 = arith.addf %22, %24 : vector<160x128xf32>
    %26 = arith.negf %25 : vector<160x128xf32>
    %27 = math.exp %26 : vector<160x128xf32>
    %cst_23 = arith.constant 1.000000e+00 : f32
    %28 = vector.broadcast %cst_23 : f32 to vector<160x128xf32>
    %29 = arith.addf %28, %27 : vector<160x128xf32>
    %30 = arith.divf %28, %29 : vector<160x128xf32>
    %31 = arith.mulf %25, %30 : vector<160x128xf32>
    %32 = arith.truncf %31 : vector<160x128xf32> to vector<160x128xbf16>
    %c0_24 = arith.constant 0 : index
    %c0_25 = arith.constant 0 : index
    %33 = vector.load %arg3[%c0_24, %c0_25] : memref<128x128xbf16, #tpu.memory_space<vmem>>, vector<128x128xbf16>
    %cst_26 = arith.constant dense<0.000000e+00> : vector<160x128xf32>
    %34 = tpu.matmul %32, %33, %cst_26 {dimension_numbers = #tpu.dot_dimension_numbers<[1], [0], [0], [1], [0, 0, 1, 1], [], []>} : vector<160x128xbf16>, vector<128x128xbf16>, vector<160x128xf32> -> vector<160x128xf32>
    %c1_27 = arith.constant 1 : index
    %c0_28 = arith.constant 0 : index
    %35 = vector.load %arg5[%c1_27, %c0_28] : memref<3x128xf32, #tpu.memory_space<vmem>>, vector<1x128xf32>
    %36 = vector.broadcast %35 : vector<1x128xf32> to vector<160x128xf32>
    %37 = arith.addf %34, %36 : vector<160x128xf32>
    %38 = arith.negf %37 : vector<160x128xf32>
    %39 = math.exp %38 : vector<160x128xf32>
    %cst_29 = arith.constant 1.000000e+00 : f32
    %40 = vector.broadcast %cst_29 : f32 to vector<160x128xf32>
    %41 = arith.addf %40, %39 : vector<160x128xf32>
    %42 = arith.divf %40, %41 : vector<160x128xf32>
    %43 = arith.mulf %37, %42 : vector<160x128xf32>
    %44 = vector.shape_cast %43 : vector<160x128xf32> to vector<2x80x128xf32>
    %c0_30 = arith.constant 0 : index
    %c0_31 = arith.constant 0 : index
    %45 = vector.load %arg6[%c0_30, %c0_31] : memref<80x1xf32, #tpu.memory_space<vmem>>, vector<80x1xf32>
    %46 = vector.shape_cast %45 : vector<80x1xf32> to vector<1x80x1xf32>
    %47 = vector.broadcast %46 : vector<1x80x1xf32> to vector<2x80x128xf32>
    %48 = arith.mulf %44, %47 : vector<2x80x128xf32>
    %cst_32 = arith.constant dense<0.000000e+00> : vector<2x128xf32>
    %49 = vector.multi_reduction <add>, %48, %cst_32 [1] : vector<2x80x128xf32> to vector<2x128xf32>
    %c0_33 = arith.constant 0 : index
    %c0_34 = arith.constant 0 : index
    %50 = vector.load %arg8[%c0_33, %c0_34] : memref<2x128xf32, #tpu.memory_space<vmem>>, vector<2x128xf32>
    tpu.vector_store %arg8[%c0_33, %c0_34], %49 {strides = array<i32>} : memref<2x128xf32, #tpu.memory_space<vmem>>, vector<2x128xf32>,
    %51 = arith.truncf %49 : vector<2x128xf32> to vector<2x128xbf16>
    %c0_35 = arith.constant 0 : index
    %c0_36 = arith.constant 0 : index
    %52 = vector.load %arg4[%c0_35, %c0_36] : memref<128x128xbf16, #tpu.memory_space<vmem>>, vector<128x128xbf16>
    %cst_37 = arith.constant dense<0.000000e+00> : vector<2x128xf32>
    %53 = tpu.matmul %51, %52, %cst_37 {dimension_numbers = #tpu.dot_dimension_numbers<[1], [0], [0], [1], [0, 0, 1, 1], [], []>} : vector<2x128xbf16>, vector<128x128xbf16>, vector<2x128xf32> -> vector<2x128xf32>
    %c2_38 = arith.constant 2 : index
    %c0_39 = arith.constant 0 : index
    %54 = vector.load %arg5[%c2_38, %c0_39] : memref<3x128xf32, #tpu.memory_space<vmem>>, vector<1x128xf32>
    %55 = vector.broadcast %54 : vector<1x128xf32> to vector<2x128xf32>
    %56 = arith.addf %53, %55 : vector<2x128xf32>
    %c0_40 = arith.constant 0 : index
    %c0_41 = arith.constant 0 : index
    %57 = vector.load %arg7[%c0_40, %c0_41] : memref<2x128xf32, #tpu.memory_space<vmem>>, vector<2x128xf32>
    tpu.vector_store %arg7[%c0_40, %c0_41], %56 {strides = array<i32>} : memref<2x128xf32, #tpu.memory_space<vmem>>, vector<2x128xf32>,
    return
  }
  func.func @transform_0(%arg0: i32) -> (i32, i32, i32) {
    %c0_i32 = arith.constant 0 : i32
    %c0_i32_0 = arith.constant 0 : i32
    %c0_i32_1 = arith.constant 0 : i32
    return %arg0, %c0_i32, %c0_i32_0 : i32, i32, i32
  }
  func.func @transform_1(%arg0: i32) -> (i32, i32, i32) {
    %c0_i32 = arith.constant 0 : i32
    %c0_i32_0 = arith.constant 0 : i32
    %c0_i32_1 = arith.constant 0 : i32
    %c0_i32_2 = arith.constant 0 : i32
    return %c0_i32, %c0_i32_0, %c0_i32_1 : i32, i32, i32
  }
  func.func @transform_2(%arg0: i32) -> (i32, i32) {
    %c0_i32 = arith.constant 0 : i32
    %c0_i32_0 = arith.constant 0 : i32
    %c0_i32_1 = arith.constant 0 : i32
    return %c0_i32, %c0_i32_0 : i32, i32
  }
  func.func @transform_3(%arg0: i32) -> (i32, i32) {
    %c0_i32 = arith.constant 0 : i32
    %c0_i32_0 = arith.constant 0 : i32
    %c0_i32_1 = arith.constant 0 : i32
    return %c0_i32, %c0_i32_0 : i32, i32
  }
  func.func @transform_4(%arg0: i32) -> (i32, i32) {
    %c0_i32 = arith.constant 0 : i32
    %c0_i32_0 = arith.constant 0 : i32
    %c0_i32_1 = arith.constant 0 : i32
    return %c0_i32, %c0_i32_0 : i32, i32
  }
  func.func @transform_5(%arg0: i32) -> (i32, i32) {
    %c0_i32 = arith.constant 0 : i32
    %c0_i32_0 = arith.constant 0 : i32
    %c0_i32_1 = arith.constant 0 : i32
    return %c0_i32, %c0_i32_0 : i32, i32
  }
  func.func @transform_6(%arg0: i32) -> (i32, i32) {
    %c0_i32 = arith.constant 0 : i32
    %c0_i32_0 = arith.constant 0 : i32
    return %arg0, %c0_i32 : i32, i32
  }
  func.func @transform_7(%arg0: i32) -> (i32, i32) {
    %c0_i32 = arith.constant 0 : i32
    %c0_i32_0 = arith.constant 0 : i32
    return %arg0, %c0_i32 : i32, i32
  }
}

</mosaic_0001>

<bundles_post_ra>
// kernel: feature_extractor_wrapper_forward.1
= control target key start
LH: loop header
LB: loop body
LE: loop exit
PB: predicated region body
PF: predicated region fallthrough
CT: control target
= control target key end

     0   :  { %13 = vsyncpa [#allocation3], 0  ;;  %vm52_vm0 = vsmask.f32 3328  ;;  %vm53_vm1 = vsmask.f32 7440  ;;  %s4059_s0 = inlined_call_operand.vmem [shape: bf16[2,96,16], index: 0, kind: input, shape index: {}]   ;;  %s4060_s1 = inlined_call_operand.vmem [shape: bf16[4,16,128], index: 1, kind: input, shape index: {}]   ;;  %s4061_s2 = inlined_call_operand.vmem [shape: bf16[128,128], index: 2, kind: input, shape index: {}]   ;;  %s4062_s3 = inlined_call_operand.vmem [shape: bf16[128,128], index: 3, kind: input, shape index: {}]   ;;  %s4063_s4 = inlined_call_operand.vmem [shape: f32[3,128], index: 4, kind: input, shape index: {}]   ;;  %s4064_s5 = inlined_call_operand.vmem [shape: f32[80,1], index: 5, kind: input, shape index: {}]   ;;  %s4065_s6 = inlined_call_operand.hbm [shape: f32[2,128], index: 6, kind: output, shape index: {0}]   ;;  %s4066_s7 = inlined_call_operand.hbm [shape: f32[2,128], index: 7, kind: output, shape index: {1}]  }
   0x1   :  { %v2565_v0 = vld [vmem:[%s4060_s1 + $0x8] sm:$0xff]  ;;  %v34_v1 = vld [vmem:[%s4059_s0 + $0x18] sm:$0xf]  ;;  %v35_v2 = vld [vmem:[%s4059_s0 + $0x1c] sm:$0xf]  ;;  %vm302_vm2 = vcmask 130048  }
   0x2   :  { %v36_v3 = vld [vmem:[%s4059_s0 + $0x20] sm:$0xf]  ;;  %2584 = vmatpush.bf16.msra.mxu1 %v2565_v0  ;;  %2585 = vmatpush.bf16.msra.mxu2 %v2565_v0  ;;  %v115_v4 = vshll.u32 %v34_v1, 16  ;;  %v119_v5 = vshrl.u32 %v34_v1, 16  ;;  %v125_v6 = vshll.u32 %v35_v2, 16  ;;  %v129_v7 = vshrl.u32 %v35_v2, 16  ;;  %vm2887_vm3 = vmor %vm52_vm0, %vm53_vm1 }
   0x3   :  { %v37_v8 = vld [vmem:[%s4059_s0 + $0x24] sm:$0xf]  ;;  %2586 = vmatpush.bf16.msra.mxu3 %v2565_v0  ;;  %v135_v9 = vshll.u32 %v36_v3, 16  ;;  %v139_v10 = vshrl.u32 %v36_v3, 16  ;;  %v50_v11 = vld [vmem:[%s4059_s0 + $0x28] sm:$0x1]  ;;  %340 = vmatpush.bf16.msra.mxu0 %v2565_v0 }
   0x4   :  { %v145_v12 = vshll.u32 %v37_v8, 16  ;;  %v149_v13 = vshrl.u32 %v37_v8, 16  ;;  %v2870_v14 = vrot.slane %v115_v4, 5  ;;  %v121_v15 = vrot.slane %v119_v5, 4  ;;  %v42_v18 = vld [vmem:[%s4059_s0 + $0x40] sm:$0xf] }
   0x5   :  { %v127_v16 = vrot.slane %v125_v6, 5  ;;  %v131_v17 = vrot.slane %v129_v7, 4  ;;  %v137_v19 = vrot.slane %v135_v9, 5  ;;  %v141_v20 = vrot.slane %v139_v10, 4  ;;  %v43_v23 = vld [vmem:[%s4059_s0 + $0x44] sm:$0xf] }
   0x6   :  { %v147_v21 = vrot.slane %v145_v12, 5  ;;  %v151_v22 = vrot.slane %v149_v13, 4  ;;  %v122_v24 = vor.u32 %v121_v15, %v2870_v14  ;;  %v155_v26 = vshll.u32 %v50_v11, 16  ;;  %v2566_v28 = vld [vmem:[%s4060_s1 + $0x10] sm:$0xff]  ;;  %v2567_v29 = vld [vmem:[%s4060_s1 + $0x18] sm:$0xff]  ;;  %v2564_v36 = vld [vmem:[%s4060_s1] sm:$0xff] }
   0x7   :  { %v132_v25 = vor.u32 %v131_v17, %v127_v16  ;;  %v199_v27 = vshll.u32 %v42_v18, 16  ;;  %v142_v31 = vor.u32 %v141_v20, %v137_v19  ;;  %v44_v33 = vld [vmem:[%s4059_s0 + $0x48] sm:$0xf]  ;;  %v203_v34 = vshrl.u32 %v42_v18, 16  ;;  %843 = vmatpush.bf16.msrb.mxu2 %v2566_v28  ;;  %1080 = vmatpush.bf16.msrb.mxu3 %v2567_v29  ;;  %v38_v49 = vld [vmem:[%s4059_s0 + $0x30] sm:$0xf] }
   0x8   :  { %v152_v32 = vor.u32 %v151_v22, %v147_v21  ;;  %v209_v35 = vshll.u32 %v43_v23, 16  ;;  %v123_v37 = vrot.slane %v122_v24, 4  ;;  %v157_v39 = vrot.slane %v155_v26, 5  ;;  %485 = vmatpush.bf16.msrb.mxu1 %v2564_v36  ;;  %v39_v54 = vld [vmem:[%s4059_s0 + $0x34] sm:$0xf] }
   0x9   :  { %v133_v38 = vrot.slane %v132_v25, 4  ;;  %v2897_v40 = vrot.slane %v199_v27, 5  ;;  %v143_v41 = vrot.slane %v142_v31, 4  ;;  %v205_v43 = vrot.slane %v203_v34, 4  ;;  %v40_v55 = vld [vmem:[%s4059_s0 + $0x38] sm:$0xf] }
   0xa   :  { %v153_v42 = vrot.slane %v152_v32, 4  ;;  %v211_v44 = vrot.slane %v209_v35, 5  ;;  %v128_v45 = vsel %vm2887_vm3, %v123_v37, %v127_v16  ;;  %v213_v47 = vshrl.u32 %v43_v23, 16 }
   0xb   :  { %v138_v46 = vsel %vm2887_vm3, %v133_v38, %v137_v19  ;;  %v219_v48 = vshll.u32 %v44_v33, 16  ;;  %v272_v50 = vunpack.c.l.b16 %v128_v45  ;;  %v148_v52 = vsel %vm2887_vm3, %v143_v41, %v147_v21 }
   0xc   :  { %v273_v51 = vunpack.c.l.b16 %v138_v46  ;;  %v158_v53 = vsel %vm2887_vm3, %v153_v42, %v157_v39  ;;  %v274_v56 = vunpack.c.l.b16 %v148_v52  ;;  %v206_v58 = vor.u32 %v205_v43, %v2897_v40 }
   0xd   :  { %v275_v57 = vunpack.c.l.b16 %v158_v53  ;;  %v215_v59 = vrot.slane %v213_v47, 4  ;;  %v221_v61 = vrot.slane %v219_v48, 5  ;;  %v223_v62 = vshrl.u32 %v44_v33, 16 }
   0xe   :  { %v289_v60 = vpack.c.b16 %v273_v51, %v272_v50  ;;  %v160_v63 = vshrl.u32 %v38_v49, 16  ;;  %v207_v1 = vrot.slane %v206_v58, 4  ;;  %v163_v3 = vshll.u32 %v38_v49, 16 }
   0xf   :  { %v290_v0 = vpack.c.b16 %v275_v57, %v274_v56  ;;  %v216_v2 = vor.u32 %v215_v59, %v211_v44 }
  0x10   :  { %14 = vsyncpa [#allocation5], 0  ;;  %2355 = vmatmul.msk.bf16.vlgmr.msra.gmra.mxu1 %vm302_vm2, %v289_v60  ;;  %v162_v4 = vrot.slane %v160_v63, 4  ;;  %v169_v5 = vshll.u32 %v39_v54, 16  ;;  %v173_v6 = vshrl.u32 %v39_v54, 16  ;;  %v179_v7 = vshll.u32 %v40_v55, 16 }
  0x11   :  { %v45_v8 = vld [vmem:[%s4059_s0 + $0x4c] sm:$0xf]  ;;  %2356 = vmatmul.msk.bf16.vlgmr.msra.gmra.mxu2 %vm302_vm2, %v290_v0  ;;  %v212_v9 = vsel %vm2887_vm3, %v207_v1, %v211_v44  ;;  %v217_v10 = vrot.slane %v216_v2, 4  ;;  %v165_v11 = vrot.slane %v163_v3, 5  ;;  %v183_v12 = vshrl.u32 %v40_v55, 16  ;;  %v2554_v56 = vld [vmem:[%s4059_s0] sm:$0xff] }
  0x12   :  { %v46_v13 = vld [vmem:[%s4059_s0 + $0x50] sm:$0xf]  ;;  %v280_v15 = vunpack.c.l.b16 %v212_v9  ;;  %v171_v16 = vrot.slane %v169_v5, 5  ;;  %v175_v17 = vrot.slane %v173_v6, 4  ;;  %v181_v18 = vrot.slane %v179_v7, 5  ;;  %s2332_s8 = sshll.u32 %s4066_s7, 4  ;;  %s2333_s8 = int_to_ptr.hbm [resolvable:$true] %s2332_s8 }
  0x13   :  { %v222_v19 = vsel %vm2887_vm3, %v217_v10, %v221_v61  ;;  %v166_v20 = vor.u32 %v165_v11, %v162_v4  ;;  %v225_v21 = vrot.slane %v223_v62, 4  ;;  %v229_v22 = vshll.u32 %v45_v8, 16  ;;  %v41_v27 = vld [vmem:[%s4059_s0 + $0x3c] sm:$0xf]  ;;  %v47_v44 = vld [vmem:[%s4059_s0 + $0x54] sm:$0xf] }
  0x14   :  { %v281_v23 = vunpack.c.l.b16 %v222_v19  ;;  %v176_v24 = vor.u32 %v175_v17, %v171_v16  ;;  %v233_v25 = vshrl.u32 %v45_v8, 16  ;;  %v239_v26 = vshll.u32 %v46_v13, 16  ;;  %v28_v58 = vld [vmem:[%s4059_s0] sm:$0xf]  ;;  %v51_v1 = vld [vmem:[%s4059_s0 + $0x58] sm:$0x1] }
  0x15   :  { %v167_v28 = vrot.slane %v166_v20, 4  ;;  %v226_v29 = vor.u32 %v225_v21, %v221_v61  ;;  %v231_v31 = vrot.slane %v229_v22, 5  ;;  %v185_v37 = vrot.slane %v183_v12, 4  ;;  %v29_v61 = vld [vmem:[%s4059_s0 + $0x4] sm:$0xf]  ;;  %s2811_s11 = smov [#allocation2]  }
  0x16   :  { %v293_v32 = vpack.c.b16 %v281_v23, %v280_v15  ;;  %v177_v33 = vrot.slane %v176_v24, 4  ;;  %v235_v34 = vrot.slane %v233_v25, 4  ;;  %v189_v38 = vshll.u32 %v41_v27, 16  ;;  %v30_v5 = vld [vmem:[%s4059_s0 + $0x8] sm:$0xf]  ;;  %s2321_s14 = sshll.u32 %s4065_s6, 4  ;;  %s2322_s14 = int_to_ptr.hbm [resolvable:$true] %s2321_s14 }
  0x17   :  { %v172_v35 = vsel %vm2887_vm3, %v167_v28, %v171_v16  ;;  %v227_v36 = vrot.slane %v226_v29, 4  ;;  %v241_v42 = vrot.slane %v239_v26, 5  ;;  %v193_v43 = vshrl.u32 %v41_v27, 16  ;;  %v2969_v19 = vld [vmem:[%s4059_s0 + $0x8] sm:$0xf] }
  0x18   :  { %2359 = vmatmul.msk.bf16.vlgmr.msra.gmra.mxu3 %vm302_vm2, %v293_v32  ;;  %v182_v39 = vsel %vm2887_vm3, %v177_v33, %v181_v18  ;;  %v236_v41 = vor.u32 %v235_v34, %v231_v31  ;;  %v276_v45 = vunpack.c.l.b16 %v172_v35  ;;  %v243_v47 = vshrl.u32 %v46_v13, 16  ;;  %v537_v13 = vld [vmem:[%s4059_s0 + $0x4] sm:$0xf] }
  0x19   :  { %v277_v46 = vunpack.c.l.b16 %v182_v39  ;;  %v191_v48 = vrot.slane %v189_v38, 5  ;;  %v186_v50 = vor.u32 %v185_v37, %v181_v18  ;;  %v195_v51 = vrot.slane %v193_v43, 4 }
  0x1a   :  { %v237_v49 = vrot.slane %v236_v41, 4  ;;  %v232_v52 = vsel %vm2887_vm3, %v227_v36, %v231_v31  ;;  %v249_v53 = vshll.u32 %v47_v44, 16  ;;  %v253_v54 = vshrl.u32 %v47_v44, 16  ;;  %v31_v44 = vld [vmem:[%s4059_s0 + $0xc] sm:$0xf] }
  0x1b   :  { %v196_v57 = vor.u32 %v195_v51, %v191_v48  ;;  %v291_v59 = vpack.c.b16 %v277_v46, %v276_v45  ;;  %v245_v60 = vrot.slane %v243_v47, 4  ;;  %v282_v62 = vunpack.c.l.b16 %v232_v52 }
  0x1c   :  { %v242_v55 = vsel %vm2887_vm3, %v237_v49, %v241_v42  ;;  %v187_v0 = vrot.slane %v186_v50, 4  ;;  %v2956_v2 = vrot.slane %v249_v53, 5  ;;  %v255_v4 = vrot.slane %v253_v54, 4  ;;  %v2990_v49 = vld [vmem:[%s4059_s0 + $0xc] sm:$0xf] }
  0x1d   :  { %v283_v63 = vunpack.c.l.b16 %v242_v55  ;;  %v197_v3 = vrot.slane %v196_v57, 4  ;;  %v56_v6 = vshrl.u32 %v28_v58, 16  ;;  %v59_v7 = vshll.u32 %v28_v58, 16  ;;  %v2555_v55 = vld [vmem:[%s4059_s0 + $0x8] sm:$0xff]  ;;  %v32_v57 = vld [vmem:[%s4059_s0 + $0x10] sm:$0xf] }
  0x1e   :  { %v65_v8 = vshll.u32 %v29_v61, 16  ;;  %v69_v9 = vshrl.u32 %v29_v61, 16  ;;  %v246_v10 = vor.u32 %v245_v60, %v241_v42  ;;  %v259_v11 = vshll.u32 %v51_v1, 16 }
  0x1f   :  { %v58_v12 = vrot.slane %v56_v6, 4  ;;  %v61_v15 = vrot.slane %v59_v7, 5  ;;  %v75_v18 = vshll.u32 %v30_v5, 16  ;;  %v294_v20 = vpack.c.b16 %v283_v63, %v282_v62 }
  0x20   :  { %2406 = vmatmul.msk.bf16.vlgmr.msrb.gmra.mxu1 %vm302_vm2, %v2554_v56  ;;  %v67_v16 = vrot.slane %v65_v8, 5  ;;  %v71_v17 = vrot.slane %v69_v9, 4  ;;  %v192_v21 = vsel %vm2887_vm3, %v187_v0, %v191_v48  ;;  %v202_v22 = vsel %vm2887_vm3, %v197_v3, %v2897_v40 }
  0x21   :  { %2357 = vmatmul.msk.bf16.gmra.mxu2 %vm302_vm2, %v291_v59  ;;  %v256_v23 = vor.u32 %v255_v4, %v2956_v2  ;;  %v62_v24 = vor.u32 %v61_v15, %v58_v12  ;;  %v77_v26 = vrot.slane %v75_v18, 5  ;;  %v560_v27 = vshrl.u32 %v537_v13, 16 }
  0x22   :  { %v72_v25 = vor.u32 %v71_v17, %v67_v16  ;;  %v563_v28 = vshll.u32 %v537_v13, 16  ;;  %v569_v29 = vshll.u32 %v2969_v19, 16  ;;  %v573_v31 = vshrl.u32 %v2969_v19, 16  ;;  %v3012_v13 = vld [vmem:[%s4059_s0 + $0x10] sm:$0xf] }
  0x23   :  { %v278_v32 = vunpack.c.l.b16 %v192_v21  ;;  %v63_v33 = vrot.slane %v62_v24, 4  ;;  %v79_v35 = vshrl.u32 %v30_v5, 16  ;;  %v279_v36 = vunpack.c.l.b16 %v202_v22 }
  0x24   :  { %v73_v34 = vrot.slane %v72_v25, 4  ;;  %v247_v37 = vrot.slane %v246_v10, 4  ;;  %v257_v38 = vrot.slane %v256_v23, 4  ;;  %v261_v39 = vrot.slane %v259_v11, 5 }
  0x25   :  { %v68_v40 = vsel %vm2887_vm3, %v63_v33, %v67_v16  ;;  %v562_v42 = vrot.slane %v560_v27, 4  ;;  %v565_v43 = vrot.slane %v563_v28, 5  ;;  %v571_v47 = vrot.slane %v569_v29, 5  ;;  %v915_v16 = vld [vmem:[%s4059_s0 + $0x4] sm:$0xe] }
  0x26   :  { %v78_v41 = vsel %vm2887_vm3, %v73_v34, %v77_v26  ;;  %v266_v45 = vunpack.c.l.b16 %v68_v40  ;;  %v575_v48 = vrot.slane %v573_v31, 4  ;;  %v81_v50 = vrot.slane %v79_v35, 4  ;;  %v2569_v40 = vld [vmem:[%s4061_s2 + $0x8] sm:$0xff] }
  0x27   :  { %v267_v46 = vunpack.c.l.b16 %v78_v41  ;;  %v252_v51 = vsel %vm2887_vm3, %v247_v37, %v2956_v2  ;;  %v85_v53 = vshll.u32 %v31_v44, 16  ;;  %v262_v54 = vsel %vm2887_vm3, %v257_v38, %v261_v39 }
  0x28   :  { %2360 = vmatmul.msk.bf16.gmra.mxu3 %vm302_vm2, %v294_v20  ;;  %v566_v56 = vor.u32 %v565_v43, %v562_v42  ;;  %v82_v58 = vor.u32 %v81_v50, %v77_v26  ;;  %v89_v59 = vshrl.u32 %v31_v44, 16  ;;  %v292_v60 = vpack.c.b16 %v279_v36, %v278_v32  ;;  %v3041_v43 = vld [vmem:[%s4059_s0 + $0x14] sm:$0xf] }
  0x29   :  { %v286_v52 = vpack.c.b16 %v267_v46, %v266_v45  ;;  %v576_v61 = vor.u32 %v575_v48, %v571_v47  ;;  %v579_v62 = vshll.u32 %v2990_v49, 16  ;;  %v87_v63 = vrot.slane %v85_v53, 5  ;;  %v2556_v46 = vld [vmem:[%s4059_s0 + $0x10] sm:$0xff] }
  0x2a   :  { %v83_v0 = vrot.slane %v82_v58, 4  ;;  %v284_v1 = vunpack.c.l.b16 %v252_v51  ;;  %v285_v2 = vunpack.c.l.b16 %v262_v54  ;;  %v91_v3 = vrot.slane %v89_v59, 4 }
  0x2b   :  { %2352 = vmatmul.msk.bf16.vlgmr.msra.gmra.mxu0 %vm302_vm2, %v286_v52  ;;  %v95_v4 = vshll.u32 %v32_v57, 16  ;;  %v567_v5 = vrot.slane %v566_v56, 4  ;;  %v577_v6 = vrot.slane %v576_v61, 4  ;;  %v581_v7 = vrot.slane %v579_v62, 5  ;;  %v542_v62 = vld [vmem:[%s4059_s0 + $0x18] sm:$0xf] }
  0x2c   :  { %v92_v8 = vor.u32 %v91_v3, %v87_v63  ;;  %v88_v10 = vsel %vm2887_vm3, %v83_v0, %v87_v63  ;;  %v295_v11 = vpack.c.b16 %v285_v2, %v284_v1  ;;  %vm939_vm4 = vcmask 1042432  }
  0x2d   :  { %v97_v9 = vrot.slane %v95_v4, 5  ;;  %v572_v15 = vsel %vm2887_vm3, %v567_v5, %v571_v47  ;;  %v944_v17 = vrot.slane %v2969_v19, 5  ;;  %v583_v18 = vshrl.u32 %v2990_v49, 16  ;;  %v33_v19 = vld [vmem:[%s4059_s0 + $0x14] sm:$0xf] }
  0x2e   :  { %v93_v12 = vrot.slane %v92_v8, 4  ;;  %v582_v20 = vsel %vm2887_vm3, %v577_v6, %v581_v7  ;;  %v99_v22 = vshrl.u32 %v32_v57, 16  ;;  %v268_v23 = vunpack.c.l.b16 %v88_v10 }
  0x2f   :  { %vm940_vm5 = vcmask 1046532   ;;  %v589_v25 = vshll.u32 %v3012_v13, 16  ;;  %v593_v26 = vshrl.u32 %v3012_v13, 16  ;;  %v2432_v27 = vrot.slane %v915_v16, 9 }
  0x30   :  { %2407 = vmatmul.msk.bf16.gmra.mxu1 %vm302_vm2, %v2555_v55  ;;  %v98_v21 = vsel %vm2887_vm3, %v93_v12, %v97_v9  ;;  %v947_v28 = vrot.slane %v2990_v49, 5  ;;  %v105_v29 = vshll.u32 %v33_v19, 16  ;;  %v109_v31 = vshrl.u32 %v33_v19, 16  ;;  %vm3034_vm6 = vmor %vm939_vm4, %vm940_vm5 }
  0x31   :  { %2358 = vmatmul.msk.bf16.gmra.mxu2 %vm302_vm2, %v292_v60  ;;  %v269_v24 = vunpack.c.l.b16 %v98_v21  ;;  %v770_v32 = vunpack.c.l.b16 %v572_v15  ;;  %v771_v33 = vunpack.c.l.b16 %v582_v20  ;;  %v946_v34 = vrot.slane %v944_v17, 4 }
  0x32   :  { %v585_v35 = vrot.slane %v583_v18, 4  ;;  %v101_v37 = vrot.slane %v99_v22, 4  ;;  %v107_v38 = vrot.slane %v105_v29, 5  ;;  %v111_v39 = vrot.slane %v109_v31, 4  ;;  %v2557_v18 = vld [vmem:[%s4059_s0 + $0x18] sm:$0xff] }
  0x33   :  { %v287_v36 = vpack.c.b16 %v269_v24, %v268_v23  ;;  %v591_v41 = vrot.slane %v589_v25, 5  ;;  %v595_v42 = vrot.slane %v593_v26, 4  ;;  %v790_v47 = vpack.c.b16 %v771_v33, %v770_v32  ;;  %v544_v31 = vld [vmem:[%s4059_s0 + $0x20] sm:$0xf] }
  0x34   :  { %v102_v44 = vor.u32 %v101_v37, %v97_v9  ;;  %v112_v45 = vor.u32 %v111_v39, %v107_v38  ;;  %v945_v48 = vsel %vm3034_vm6, %v2432_v27, %v944_v17  ;;  %v948_v49 = vsel %vm3034_vm6, %v946_v34, %v947_v28  ;;  %v543_v17 = vld [vmem:[%s4059_s0 + $0x1c] sm:$0xf] }
  0x35   :  { %v586_v50 = vor.u32 %v585_v35, %v581_v7  ;;  %v596_v51 = vor.u32 %v595_v42, %v591_v41  ;;  %v599_v52 = vshll.u32 %v3041_v43, 16  ;;  %v1007_v55 = vunpack.c.l.b16 %v945_v48  ;;  %v545_v48 = vld [vmem:[%s4059_s0 + $0x24] sm:$0xf] }
  0x36   :  { %v103_v53 = vrot.slane %v102_v44, 4  ;;  %v113_v54 = vrot.slane %v112_v45, 4  ;;  %v1008_v56 = vunpack.c.l.b16 %v948_v49  ;;  %v950_v1 = vrot.slane %v3012_v13, 5  ;;  %v2558_v49 = vld [vmem:[%s4059_s0 + $0x20] sm:$0xff] }
  0x37   :  { %v587_v57 = vrot.slane %v586_v50, 4  ;;  %v597_v58 = vrot.slane %v596_v51, 4  ;;  %v601_v59 = vrot.slane %v599_v52, 5  ;;  %v603_v5 = vshrl.u32 %v3041_v43, 16 }
  0x38   :  { %2361 = vmatmul.msk.bf16.gmra.mxu3 %vm302_vm2, %v295_v11  ;;  %v108_v60 = vsel %vm2887_vm3, %v103_v53, %v107_v38  ;;  %v118_v61 = vsel %vm2887_vm3, %v113_v54, %v2870_v14  ;;  %v1027_v63 = vpack.c.b16 %v1008_v56, %v1007_v55  ;;  %v609_v6 = vshll.u32 %v542_v62, 16 }
  0x39   :  { %v592_v0 = vsel %vm2887_vm3, %v587_v57, %v591_v41  ;;  %v270_v2 = vunpack.c.l.b16 %v108_v60  ;;  %v271_v3 = vunpack.c.l.b16 %v118_v61  ;;  %v602_v4 = vsel %vm2887_vm3, %v597_v58, %v601_v59  ;;  %v546_v61 = vld [vmem:[%s4059_s0 + $0x28] sm:$0xf] }
  0x3a   :  { %v613_v7 = vshrl.u32 %v542_v62, 16  ;;  %v949_v14 = vrot.slane %v947_v28, 4  ;;  %v953_v8 = vrot.slane %v3041_v43, 5  ;;  %v772_v9 = vunpack.c.l.b16 %v592_v0 }
  0x3b   :  { %2353 = vmatmul.msk.bf16.gmra.mxu0 %vm302_vm2, %v287_v36  ;;  %v773_v10 = vunpack.c.l.b16 %v602_v4  ;;  %v952_v11 = vrot.slane %v950_v1, 4  ;;  %v288_v12 = vpack.c.b16 %v271_v3, %v270_v2  ;;  %v605_v15 = vrot.slane %v603_v5, 4 }
  0x3c   :  { %v611_v13 = vrot.slane %v609_v6, 5  ;;  %v615_v16 = vrot.slane %v613_v7, 4  ;;  %v951_v21 = vsel %vm3034_vm6, %v949_v14, %v950_v1  ;;  %v619_v25 = vshll.u32 %v543_v17, 16 }
  0x3d   :  { %v791_v20 = vpack.c.b16 %v773_v10, %v772_v9  ;;  %v954_v22 = vsel %vm3034_vm6, %v952_v11, %v953_v8  ;;  %v606_v23 = vor.u32 %v605_v15, %v601_v59  ;;  %v1009_v26 = vunpack.c.l.b16 %v951_v21  ;;  %v2559_v15 = vld [vmem:[%s4059_s0 + $0x30] sm:$0xff] }
  0x3e   :  { %v616_v24 = vor.u32 %v615_v16, %v611_v13  ;;  %v1010_v19 = vunpack.c.l.b16 %v954_v22  ;;  %v621_v29 = vrot.slane %v619_v25, 5  ;;  %v956_v33 = vrot.slane %v542_v62, 5 }
  0x3f   :  { %v607_v27 = vrot.slane %v606_v23, 4  ;;  %v623_v34 = vshrl.u32 %v543_v17, 16  ;;  %v629_v37 = vshll.u32 %v544_v31, 16  ;;  %v633_v38 = vshrl.u32 %v544_v31, 16 }
  0x40   :  { %2408 = vmatmul.msk.bf16.gmra.mxu1 %vm302_vm2, %v2556_v46  ;;  %v617_v28 = vrot.slane %v616_v24, 4  ;;  %v1028_v32 = vpack.c.b16 %v1010_v19, %v1009_v26  ;;  %v955_v39 = vrot.slane %v953_v8, 4  ;;  %v959_v41 = vrot.slane %v543_v17, 5  ;;  %v548_v19 = vld [vmem:[%s4059_s0 + $0x34] sm:$0xf] }
  0x41   :  { %2422 = vmatmul.msk.bf16.vlgmr.msrb.gmra.mxu2 %vm302_vm2, %v790_v47  ;;  %v612_v35 = vsel %vm2887_vm3, %v607_v27, %v611_v13  ;;  %v958_v44 = vrot.slane %v956_v33, 4  ;;  %v625_v45 = vrot.slane %v623_v34, 4  ;;  %v631_v46 = vrot.slane %v629_v37, 5  ;;  %v549_v27 = vld [vmem:[%s4059_s0 + $0x38] sm:$0xf] }
  0x42   :  { %v622_v36 = vsel %vm2887_vm3, %v617_v28, %v621_v29  ;;  %v774_v42 = vunpack.c.l.b16 %v612_v35  ;;  %v635_v47 = vrot.slane %v633_v38, 4  ;;  %v957_v51 = vsel %vm3034_vm6, %v955_v39, %v956_v33 }
  0x43   :  { %v775_v43 = vunpack.c.l.b16 %v622_v36  ;;  %v960_v52 = vsel %vm3034_vm6, %v958_v44, %v959_v41  ;;  %v626_v53 = vor.u32 %v625_v45, %v621_v29  ;;  %v639_v55 = vshll.u32 %v545_v48, 16 }
  0x44   :  { %v636_v54 = vor.u32 %v635_v47, %v631_v46  ;;  %v1011_v56 = vunpack.c.l.b16 %v957_v51  ;;  %v1012_v57 = vunpack.c.l.b16 %v960_v52  ;;  %v643_v1 = vshrl.u32 %v545_v48, 16  ;;  %v550_v47 = vld [vmem:[%s4059_s0 + $0x3c] sm:$0xf] }
  0x45   :  { %v792_v50 = vpack.c.b16 %v775_v43, %v774_v42  ;;  %v627_v58 = vrot.slane %v626_v53, 4  ;;  %v641_v60 = vrot.slane %v639_v55, 5  ;;  %v649_v2 = vshll.u32 %v546_v61, 16 }
  0x46   :  { %v637_v59 = vrot.slane %v636_v54, 4  ;;  %v1029_v62 = vpack.c.b16 %v1012_v57, %v1011_v56  ;;  %v653_v3 = vshrl.u32 %v546_v61, 16  ;;  %v961_v6 = vrot.slane %v959_v41, 4 }
  0x47   :  { %v632_v0 = vsel %vm2887_vm3, %v627_v58, %v631_v46  ;;  %v965_v14 = vrot.slane %v545_v48, 5  ;;  %v645_v9 = vrot.slane %v643_v1, 4  ;;  %v651_v10 = vrot.slane %v649_v2, 5  ;;  %v2560_v48 = vld [vmem:[%s4059_s0 + $0x38] sm:$0xff] }
  0x48   :  { %2440 = vmatmul.msk.bf16.vlgmr.msrb.gmra.mxu3 %vm302_vm2, %v1027_v63  ;;  %v962_v63 = vrot.slane %v544_v31, 5  ;;  %v642_v4 = vsel %vm2887_vm3, %v637_v59, %v641_v60  ;;  %v776_v5 = vunpack.c.l.b16 %v632_v0  ;;  %v655_v11 = vrot.slane %v653_v3, 4 }
  0x49   :  { %v777_v8 = vunpack.c.l.b16 %v642_v4  ;;  %v664_v33 = vshrl.u32 %v548_v19, 16  ;;  %v667_v34 = vshll.u32 %v548_v19, 16  ;;  %v673_v35 = vshll.u32 %v549_v27, 16 }
  0x4a   :  { %v964_v7 = vrot.slane %v962_v63, 4  ;;  %v963_v13 = vsel %vm3034_vm6, %v961_v6, %v962_v63  ;;  %v677_v36 = vshrl.u32 %v549_v27, 16  ;;  %v967_v37 = vrot.slane %v965_v14, 4  ;;  %v916_v63 = vld [vmem:[%s4059_s0 + $0x34] sm:$0xe] }
  0x4b   :  { %2354 = vmatmul.msk.bf16.gmra.mxu0 %vm302_vm2, %v288_v12  ;;  %v547_v12 = vld [vmem:[%s4059_s0 + $0x2c] sm:$0x1]  ;;  %v793_v17 = vpack.c.b16 %v777_v8, %v776_v5  ;;  %v1013_v22 = vunpack.c.l.b16 %v963_v13  ;;  %v666_v43 = vrot.slane %v664_v33, 4  ;;  %v669_v44 = vrot.slane %v667_v34, 5 }
  0x4c   :  { %v966_v16 = vsel %vm3034_vm6, %v964_v7, %v965_v14  ;;  %v659_v21 = vshll.u32 %v547_v12, 16  ;;  %v971_v42 = vrot.slane %v547_v12, 5  ;;  %v675_v45 = vrot.slane %v673_v35, 5  ;;  %v3160_v12 = vld [vmem:[%s4059_s0 + $0x44] sm:$0xf] }
  0x4d   :  { %v1014_v23 = vunpack.c.l.b16 %v966_v16  ;;  %v679_v46 = vrot.slane %v677_v36, 4  ;;  %v670_v52 = vor.u32 %v669_v44, %v666_v43  ;;  %v683_v54 = vshll.u32 %v550_v47, 16 }
  0x4e   :  { %v661_v26 = vrot.slane %v659_v21, 5  ;;  %v687_v0 = vshrl.u32 %v550_v47, 16  ;;  %v2433_v5 = vrot.slane %v916_v63, 9  ;;  %v978_v8 = vrot.slane %v550_v47, 5 }
  0x4f   :  { %v1030_v28 = vpack.c.b16 %v1014_v23, %v1013_v22  ;;  %v680_v53 = vor.u32 %v679_v46, %v675_v45  ;;  %v671_v57 = vrot.slane %v670_v52, 4  ;;  %v685_v59 = vrot.slane %v683_v54, 5 }
  0x50   :  { %2409 = vmatmul.msk.bf16.gmra.mxu1 %vm302_vm2, %v2557_v18  ;;  %v646_v18 = vor.u32 %v645_v9, %v641_v60  ;;  %v551_v60 = vld [vmem:[%s4059_s0 + $0x40] sm:$0xf]  ;;  %v689_v9 = vrot.slane %v687_v0, 4  ;;  %v703_v22 = vshll.u32 %v3160_v12, 16  ;;  %v707_v35 = vshrl.u32 %v3160_v12, 16 }
  0x51   :  { %2423 = vmatmul.msk.bf16.gmra.mxu2 %vm302_vm2, %v791_v20  ;;  %v656_v20 = vor.u32 %v655_v11, %v651_v10  ;;  %v681_v58 = vrot.slane %v680_v53, 4  ;;  %v676_v1 = vsel %vm2887_vm3, %v671_v57, %v675_v45  ;;  %v693_v3 = vshll.u32 %v551_v60, 16  ;;  %v3218_v0 = vld [vmem:[%s4059_s0 + $0x50] sm:$0xf] }
  0x52   :  { %v647_v24 = vrot.slane %v646_v18, 4  ;;  %v697_v4 = vshrl.u32 %v551_v60, 16  ;;  %v780_v7 = vunpack.c.l.b16 %v676_v1  ;;  %v705_v19 = vrot.slane %v703_v22, 5  ;;  %v3242_v22 = vld [vmem:[%s4059_s0 + $0x54] sm:$0xf] }
  0x53   :  { %v657_v25 = vrot.slane %v656_v20, 4  ;;  %v686_v2 = vsel %vm2887_vm3, %v681_v58, %v685_v59  ;;  %v690_v20 = vor.u32 %v689_v9, %v685_v59  ;;  %v981_v33 = vrot.slane %v551_v60, 5 }
  0x54   :  { %v652_v29 = vsel %vm2887_vm3, %v647_v24, %v651_v10  ;;  %v781_v14 = vunpack.c.l.b16 %v686_v2  ;;  %v695_v10 = vrot.slane %v693_v3, 5  ;;  %v699_v11 = vrot.slane %v697_v4, 4 }
  0x55   :  { %v662_v31 = vsel %vm2887_vm3, %v657_v25, %v661_v26  ;;  %v778_v38 = vunpack.c.l.b16 %v652_v29  ;;  %v691_v25 = vrot.slane %v690_v20, 4  ;;  %v984_v43 = vrot.slane %v3160_v12, 5 }
  0x56   :  { %v779_v39 = vunpack.c.l.b16 %v662_v31  ;;  %v795_v16 = vpack.c.b16 %v781_v14, %v780_v7  ;;  %v700_v21 = vor.u32 %v699_v11, %v695_v10  ;;  %v709_v44 = vrot.slane %v707_v35, 4  ;;  %v2575_v11 = vld [vmem:[%s4061_s2 + $0x38] sm:$0xff] }
  0x57   :  { %v733_v14 = vshll.u32 %v3218_v0, 16  ;;  %v986_v9 = vrot.slane %v984_v43, 4  ;;  %1650 = vmatpush.bf16.msrb.mxu0 %v2575_v11 }
  0x58   :  { %2441 = vmatmul.msk.bf16.gmra.mxu3 %vm302_vm2, %v1028_v32  ;;  %v968_v32 = vrot.slane %v546_v61, 5  ;;  %v701_v26 = vrot.slane %v700_v21, 4 }
  0x5a   :  { %v970_v41 = vrot.slane %v968_v32, 4  ;;  %v706_v34 = vsel %vm2887_vm3, %v701_v26, %v705_v19 }
  0x5c   :  { %v972_v51 = vsel %vm3034_vm6, %v970_v41, %v971_v42  ;;  %v783_v41 = vunpack.c.l.b16 %v706_v34  ;;  %v983_v42 = vrot.slane %v981_v33, 4 }
  0x5d   :  { %v1016_v56 = vunpack.c.l.b16 %v972_v51 }
  0x5e   :  { %v985_v54 = vsel %vm3034_vm6, %v983_v42, %v984_v43 }
  0x5f   :  { %v1020_v59 = vunpack.c.l.b16 %v985_v54 }
  0x60   :  { %2410 = vmatmul.msk.bf16.gmra.mxu1 %vm302_vm2, %v2558_v49  ;;  %v794_v49 = vpack.c.b16 %v779_v39, %v778_v38  ;;  %v980_v38 = vrot.slane %v978_v8, 4 }
  0x61   :  { %2424 = vmatmul.msk.bf16.gmra.mxu2 %vm302_vm2, %v792_v50  ;;  %v969_v50 = vsel %vm3034_vm6, %v967_v37, %v968_v32  ;;  %v696_v32 = vsel %vm2887_vm3, %v691_v25, %v695_v10 }
  0x62   :  { %v1015_v55 = vunpack.c.l.b16 %v969_v50  ;;  %v782_v39 = vunpack.c.l.b16 %v696_v32  ;;  %v2562_v50 = vld [vmem:[%s4059_s0 + $0x48] sm:$0xff]  ;;  %v982_v53 = vsel %vm3034_vm6, %v980_v38, %v981_v33  ;;  %v743_v32 = vshll.u32 %v3242_v22, 16 }
  0x63   :  { %v1019_v58 = vunpack.c.l.b16 %v982_v53 }
  0x64   :  { %v1031_v61 = vpack.c.b16 %v1016_v56, %v1015_v55  ;;  %v796_v52 = vpack.c.b16 %v783_v41, %v782_v39  ;;  %v710_v55 = vor.u32 %v709_v44, %v705_v19  ;;  %v745_v38 = vrot.slane %v743_v32, 5  ;;  %v3263_v41 = vld [vmem:[%s4059_s0 + $0x58] sm:$0xf] }
  0x65   :  { %v1033_v1 = vpack.c.b16 %v1020_v59, %v1019_v58  ;;  %v996_v58 = vrot.slane %v3242_v22, 5 }
  0x66   :  { %v711_v60 = vrot.slane %v710_v55, 4 }
  0x68   :  { %2442 = vmatmul.msk.bf16.gmra.mxu3 %vm302_vm2, %v1029_v62  ;;  %v975_v62 = vrot.slane %v549_v27, 5  ;;  %v3177_v27 = vld [vmem:[%s4059_s0 + $0x48] sm:$0xf] }
  0x69   :  { %v713_v36 = vshll.u32 %v3177_v27, 16  ;;  %v717_v37 = vshrl.u32 %v3177_v27, 16  ;;  %v987_v3 = vrot.slane %v3177_v27, 5 }
  0x6a   :  { %v977_v6 = vrot.slane %v975_v62, 4 }
  0x6b   :  { %v715_v45 = vrot.slane %v713_v36, 5  ;;  %v719_v46 = vrot.slane %v717_v37, 4  ;;  %v989_v10 = vrot.slane %v987_v3, 4  ;;  %v988_v26 = vsel %vm3034_vm6, %v986_v9, %v987_v3 }
  0x6c   :  { %v979_v18 = vsel %vm3034_vm6, %v977_v6, %v978_v8  ;;  %v737_v8 = vshrl.u32 %v3218_v0, 16  ;;  %v1021_v34 = vunpack.c.l.b16 %v988_v26 }
  0x6d   :  { %v1018_v24 = vunpack.c.l.b16 %v979_v18  ;;  %v720_v56 = vor.u32 %v719_v46, %v715_v45  ;;  %v716_v6 = vsel %vm2887_vm3, %v711_v60, %v715_v45  ;;  %v735_v18 = vrot.slane %v733_v14, 5  ;;  %v2574_v14 = vld [vmem:[%s4061_s2 + $0x30] sm:$0xff] }
  0x6e   :  { %v784_v12 = vunpack.c.l.b16 %v716_v6  ;;  %v739_v20 = vrot.slane %v737_v8, 4  ;;  %v993_v45 = vrot.slane %v3218_v0, 5  ;;  %1651 = vmatpush.bf16.msrb.mxu0 %v2574_v14  ;;  %v2568_v14 = vld [vmem:[%s4061_s2] sm:$0xff] }
  0x70   :  { %2411 = vmatmul.msk.bf16.gmra.mxu1 %vm302_vm2, %v2559_v15  ;;  %v2561_v15 = vld [vmem:[%s4059_s0 + $0x40] sm:$0xff] }
  0x71   :  { %2425 = vmatmul.msk.bf16.gmra.mxu2 %vm302_vm2, %v793_v17  ;;  %v976_v17 = vsel %vm3034_vm6, %v2433_v5, %v975_v62 }
  0x72   :  { %v1017_v23 = vunpack.c.l.b16 %v976_v17 }
  0x78   :  { %2443 = vmatmul.msk.bf16.gmra.mxu3 %vm302_vm2, %v1030_v28  ;;  %v1032_v28 = vpack.c.b16 %v1018_v24, %v1017_v23  ;;  %v2563_v24 = vld [vmem:[%s4059_s0 + $0x50] sm:$0xff] }
  0x80   :  { %2412 = vmatmul.msk.bf16.gmra.mxu1 %vm302_vm2, %v2560_v48  ;;  %v3197_v48 = vld [vmem:[%s4059_s0 + $0x4c] sm:$0xf] }
  0x81   :  { %2426 = vmatmul.msk.bf16.gmra.mxu2 %vm302_vm2, %v794_v49  ;;  %v723_v57 = vshll.u32 %v3197_v48, 16  ;;  %v727_v4 = vshrl.u32 %v3197_v48, 16 }
  0x83   :  { %v725_v62 = vrot.slane %v723_v57, 5  ;;  %v729_v17 = vrot.slane %v727_v4, 4  ;;  %v995_v57 = vrot.slane %v993_v45, 4 }
  0x85   :  { %v730_v27 = vor.u32 %v729_v17, %v725_v62 }
  0x87   :  { %v731_v36 = vrot.slane %v730_v27, 4  ;;  %v999_v27 = vrot.slane %v3263_v41, 5 }
  0x88   :  { %2444 = vmatmul.msk.bf16.gmra.mxu3 %vm302_vm2, %v1031_v61  ;;  %v721_v61 = vrot.slane %v720_v56, 4 }
  0x89   :  { %v736_v44 = vsel %vm2887_vm3, %v731_v36, %v735_v18 }
  0x8a   :  { %v726_v7 = vsel %vm2887_vm3, %v721_v61, %v725_v62  ;;  %v786_v55 = vunpack.c.l.b16 %v736_v44  ;;  %v3317_v44 = vld [vmem:[%s4063_s4] ss:$0 sm:$0xff] }
  0x8d   :  { %v3165_v13 = vpop.f32.mrf.mxu1 }
  0x90   :  { %2413 = vmatmul.msk.bf16.gmra.mxu1 %vm302_vm2, %v2561_v15  ;;  %v785_v15 = vunpack.c.l.b16 %v726_v7  ;;  %v997_v7 = vsel %vm3034_vm6, %v995_v57, %v996_v58 }
  0x91   :  { %2427 = vmatmul.msk.bf16.gmra.mxu2 %vm302_vm2, %v795_v16  ;;  %v990_v16 = vrot.slane %v3197_v48, 5  ;;  %v747_v48 = vshrl.u32 %v3242_v22, 16 }
  0x92   :  { %v797_v25 = vpack.c.b16 %v785_v15, %v784_v12  ;;  %v1024_v12 = vunpack.c.l.b16 %v997_v7  ;;  %v2573_v15 = vld [vmem:[%s4061_s2 + $0x28] sm:$0xff] }
  0x93   :  { %v991_v19 = vsel %vm3034_vm6, %v989_v10, %v990_v16  ;;  %v992_v54 = vrot.slane %v990_v16, 4  ;;  %v749_v60 = vrot.slane %v747_v48, 4  ;;  %1652 = vmatpush.bf16.msrb.mxu0 %v2573_v15 }
  0x94   :  { %v3179_v29 = vpop.f32.mrf.mxu2  ;;  %v1022_v35 = vunpack.c.l.b16 %v991_v19 }
  0x95   :  { %v3181_v31 = vpop.f32.mrf.mxu1  ;;  %v994_v6 = vsel %vm3034_vm6, %v992_v54, %v993_v45  ;;  %v750_v8 = vor.u32 %v749_v60, %v745_v38  ;;  %v2570_v54 = vld [vmem:[%s4061_s2 + $0x10] sm:$0xff] }
  0x96   :  { %v1034_v42 = vpack.c.b16 %v1022_v35, %v1021_v34  ;;  %v1023_v11 = vunpack.c.l.b16 %v994_v6  ;;  %v998_v35 = vrot.slane %v996_v58, 4 }
  0x97   :  { %v751_v16 = vrot.slane %v750_v8, 4 }
  0x98   :  { %2445 = vmatmul.msk.bf16.gmra.mxu3 %vm302_vm2, %v1032_v28  ;;  %v740_v28 = vor.u32 %v739_v20, %v735_v18  ;;  %v1035_v26 = vpack.c.b16 %v1024_v12, %v1023_v11 }
  0x9a   :  { %v741_v37 = vrot.slane %v740_v28, 4  ;;  %v2572_v28 = vld [vmem:[%s4061_s2 + $0x20] sm:$0xff] }
  0x9b   :  { %v3192_v47 = vpop.f32.mrf.mxu3  ;;  %1653 = vmatpush.bf16.msrb.mxu0 %v2572_v28 }
  0x9c   :  { %v3199_v49 = vpop.f32.mrf.mxu2  ;;  %v746_v46 = vsel %vm2887_vm3, %v741_v37, %v745_v38  ;;  %v1001_v38 = vrot.slane %v999_v27, 4 }
  0x9d   :  { %v3204_v51 = vpop.f32.mrf.mxu1  ;;  %v787_v56 = vunpack.c.l.b16 %v746_v46 }
  0x9f   :  { %v798_v4 = vpack.c.b16 %v787_v56, %v786_v55 }
  0xa0   :  { %2414 = vmatmul.msk.bf16.gmra.mxu1 %vm302_vm2, %v2562_v50  ;;  %v753_v50 = vshll.u32 %v3263_v41, 16 }
  0xa1   :  { %2428 = vmatmul.msk.bf16.gmra.mxu2 %vm302_vm2, %v796_v52  ;;  %v757_v52 = vshrl.u32 %v3263_v41, 16  ;;  %v2571_v41 = vld [vmem:[%s4061_s2 + $0x18] sm:$0xff] }
  0xa2   :  { %v755_v61 = vrot.slane %v753_v50, 5  ;;  %1654 = vmatpush.bf16.msrb.mxu0 %v2571_v41 }
  0xa3   :  { %v3213_v63 = vpop.f32.mrf.mxu3  ;;  %v759_v62 = vrot.slane %v757_v52, 4  ;;  %v1000_v52 = vsel %vm3034_vm6, %v998_v35, %v999_v27 }
  0xa4   :  { %v3220_v2 = vpop.f32.mrf.mxu2  ;;  %v756_v32 = vsel %vm2887_vm3, %v751_v16, %v755_v61 }
  0xa5   :  { %v3224_v5 = vpop.f32.mrf.mxu1  ;;  %v760_v9 = vor.u32 %v759_v62, %v755_v61  ;;  %v788_v36 = vunpack.c.l.b16 %v756_v32  ;;  %v1025_v61 = vunpack.c.l.b16 %v1000_v52 }
  0xa6   :  { %1655 = vmatpush.bf16.msrb.mxu0 %v2570_v54 }
  0xa7   :  { %v761_v18 = vrot.slane %v760_v9, 4 }
  0xa8   :  { %2446 = vmatmul.msk.bf16.gmra.mxu3 %vm302_vm2, %v1033_v1  ;;  %v342_v53 = vpop.f32.mrf.mxu0  ;;  %v558_v1 = vld [vmem:[%s4059_s0 + $0x5c] sm:$0x1] }
  0xa9   :  { %v763_v10 = vshll.u32 %v558_v1, 16 }
  0xaa   :  { %1656 = vmatpush.bf16.msrb.mxu0 %v2569_v40 }
  0xab   :  { %v3237_v21 = vpop.f32.mrf.mxu3  ;;  %v765_v20 = vrot.slane %v763_v10, 5 }
  0xac   :  { %v3244_v23 = vpop.f32.mrf.mxu2 }
  0xad   :  { %v3254_v33 = vpop.f32.mrf.mxu1  ;;  %v766_v34 = vsel %vm2887_vm3, %v761_v18, %v765_v20 }
  0xae   :  { %v789_v37 = vunpack.c.l.b16 %v766_v34  ;;  %1657 = vmatpush.bf16.msrb.mxu0 %v2568_v14 }
  0xb0   :  { %2415 = vmatmul.msk.bf16.gmra.mxu1 %vm302_vm2, %v2563_v24  ;;  %v344_v17 = vpop.f32.mrf.mxu0  ;;  %v488_v24 = vadd.f32 %v3204_v51, %v342_v53  ;;  %v799_v50 = vpack.c.b16 %v789_v37, %v788_v36 }
  0xb1   :  { %2429 = vmatmul.msk.bf16.gmra.mxu2 %vm302_vm2, %v797_v25  ;;  %v490_v55 = vadd.f32 %v3224_v5, %v344_v17 }
  0xb3   :  { %v3258_v39 = vpop.f32.mrf.mxu3 }
  0xb4   :  { %v3265_v43 = vpop.f32.mrf.mxu2 }
  0xb5   :  { %v3277_v59 = vpop.f32.mrf.mxu1 }
  0xb8   :  { %2447 = vmatmul.msk.bf16.gmra.mxu3 %vm302_vm2, %v1034_v42  ;;  %v1002_v42 = vrot.slane %v558_v1, 5  ;;  %v347_v46 = vpop.f32.mrf.mxu0 }
  0xb9   :  { %v493_v5 = vadd.f32 %v3254_v33, %v347_v46 }
  0xba   :  { %v1003_v53 = vsel %vm3034_vm6, %v1001_v38, %v1002_v42 }
  0xbb   :  { %v3279_v0 = vpop.f32.mrf.mxu3  ;;  %v1026_v62 = vunpack.c.l.b16 %v1003_v53 }
  0xbc   :  { %v3284_v3 = vpop.f32.mrf.mxu2 }
  0xbd   :  { %v3300_v25 = vpop.f32.mrf.mxu1  ;;  %v1036_v6 = vpack.c.b16 %v1026_v62, %v1025_v61 }
  0xc0   :  { %v349_v9 = vpop.f32.mrf.mxu0 }
  0xc1   :  { %2430 = vmatmul.msk.bf16.gmra.mxu2 %vm302_vm2, %v798_v4  ;;  %v495_v20 = vadd.f32 %v3277_v59, %v349_v9 }
  0xc3   :  { %v3297_v22 = vpop.f32.mrf.mxu3 }
  0xc4   :  { %v845_v19 = vpop.f32.mrf.mxu2 }
  0xc5   :  { %v895_v51 = vadd.f32 %v845_v19, %v488_v24  ;;  %v3330_v57 = vpop.f32.mrf.mxu1 }
  0xc8   :  { %2448 = vmatmul.msk.bf16.gmra.mxu3 %vm302_vm2, %v1035_v26  ;;  %v352_v27 = vpop.f32.mrf.mxu0 }
  0xc9   :  { %v498_v38 = vadd.f32 %v3300_v25, %v352_v27 }
  0xcb   :  { %v1082_v30 = vpop.f32.mrf.mxu3 }
  0xcc   :  { %v1132_v45 = vadd.f32 %v1082_v30, %v895_v51  ;;  %v847_v48 = vpop.f32.mrf.mxu2 }
  0xcd   :  { %v896_v60 = vadd.f32 %v847_v48, %v490_v55  ;;  %v3345_v12 = vpop.f32.mrf.mxu1 }
  0xce   :  { %v3328_v56 = vadd.f32 %v3317_v44, %v1132_v45 }
  0xd0   :  { %v2450_v58 = vmul.f32 -1.442695, %v3328_v56  ;;  %v354_v55 = vpop.f32.mrf.mxu0 }
  0xd1   :  { %2431 = vmatmul.msk.bf16.gmra.mxu2 %vm302_vm2, %v799_v50 }
  0xd2   :  { %2596 = vpow2.f32 %v2450_v58 }
  0xd3   :  { %v1084_v1 = vpop.f32.mrf.mxu3 }
  0xd4   :  { %v1133_v4 = vadd.f32 %v1084_v1, %v896_v60  ;;  %v850_v7 = vpop.f32.mrf.mxu2 }
  0xd5   :  { %v897_v33 = vadd.f32 %v850_v7, %v493_v5  ;;  %v3353_v51 = vpop.f32.mrf.mxu1  ;;  %v500_v7 = vadd.f32 %v3330_v57, %v354_v55 }
  0xd6   :  { %v3342_v8 = vadd.f32 %v3317_v44, %v1133_v4 }
  0xd8   :  { %v2597_v10 = vpop.eup %2596  ;;  %v2451_v11 = vmul.f32 -1.442695, %v3342_v8  ;;  %2449 = vmatmul.msk.bf16.gmra.mxu3 %vm302_vm2, %v1036_v6 }
  0xd9   :  { %v1234_v15 = vadd.f32 1.0, %v2597_v10 }
  0xda   :  { %2598 = vpow2.f32 %v2451_v11 }
  0xdb   :  { %2600 = vrcp.f32 %v1234_v15  ;;  %v1087_v16 = vpop.f32.mrf.mxu3  ;;  %v1263_v58 = vand.u32 2147483647, %v1234_v15  ;;  %v1265_v25 = vand.u32 2147483648, %v1234_v15  ;;  %vm1259_vm8 = vweird.f32 %v1234_v15 }
  0xdc   :  { %v1134_v17 = vadd.f32 %v1087_v16, %v897_v33  ;;  %v852_v18 = vpop.f32.mrf.mxu2 }
  0xdd   :  { %v898_v28 = vadd.f32 %v852_v18, %v495_v20  ;;  %v3363_v62 = vpop.f32.mrf.mxu1  ;;  %vm1264_vm11 = vcmp.eq.f32.partialorder %v1263_v58, 8.507059e+37  ;;  %v1266_v11 = vor.u32 1.1754944e-38, %v1265_v25 }
  0xde   :  { %v3350_v24 = vadd.f32 %v3317_v44, %v1134_v17 }
  0xe0   :  { %v2599_v26 = vpop.eup %2598  ;;  %v2452_v19 = vmul.f32 -1.442695, %v3350_v24 }
  0xe1   :  { %v2601_v32 = vpop.eup %2600  ;;  %v1235_v34 = vadd.f32 1.0, %v2599_v26 }
  0xe2   :  { %v1255_v35 = vmul.f32 %v2601_v32, %v1234_v15  ;;  %2602 = vpow2.f32 %v2452_v19  ;;  %vm1260_vm7 = vweird.f32 %v2601_v32 }
  0xe3   :  { %2604 = vrcp.f32 %v1235_v34  ;;  %v1089_v36 = vpop.f32.mrf.mxu3  ;;  %vm3365_vm9 = vmor %vm1259_vm8, %vm1260_vm7  ;;  %v1278_v4 = vand.u32 2147483647, %v1235_v34  ;;  %v1280_v6 = vand.u32 2147483648, %v1235_v34  ;;  %vm1274_vm12 = vweird.f32 %v1235_v34 }
  0xe4   :  { %v1256_v37 = vsub.f32 1.0, %v1255_v35  ;;  %v1135_v59 = vadd.f32 %v1089_v36, %v898_v28  ;;  %v855_v42 = vpop.f32.mrf.mxu2 }
  0xe5   :  { %v899_v48 = vadd.f32 %v855_v42, %v498_v38  ;;  %v1281_v57 = vor.u32 1.1754944e-38, %v1280_v6  ;;  %vm1279_vm14 = vcmp.eq.f32.partialorder %v1278_v4, 8.507059e+37  ;;  %v3381_v42 = vpop.f32.mrf.mxu1 }
  0xe6   :  { %v1257_v41 = vmul.f32 %v2601_v32, %v1256_v37  ;;  %v3357_v30 = vadd.f32 %v3317_v44, %v1135_v59  ;;  %v503_v59 = vadd.f32 %v3345_v12, %v3165_v13 }
  0xe8   :  { %v2603_v45 = vpop.eup %2602  ;;  %v2453_v46 = vmul.f32 -1.442695, %v3357_v30  ;;  %v1258_v53 = vadd.f32 %v2601_v32, %v1257_v41 }
  0xe9   :  { %v2605_v50 = vpop.eup %2604  ;;  %v3360_v52 = vadd.f32 1.0, %v2603_v45 }
  0xea   :  { %v1270_v54 = vmul.f32 %v2605_v50, %v1235_v34  ;;  %2606 = vpow2.f32 %v2453_v46  ;;  %v1262_v14 = vsel %vm3365_vm9, %v2601_v32, %v1258_v53  ;;  %vm1275_vm10 = vweird.f32 %v2605_v50 }
  0xeb   :  { %2608 = vrcp.f32 %v3360_v52  ;;  %v1092_v60 = vpop.f32.mrf.mxu3  ;;  %v1267_v20 = vsel %vm1264_vm11, %v1266_v11, %v1262_v14  ;;  %vm1276_vm13 = vmor %vm1274_vm12, %vm1275_vm10  ;;  %v1293_v12 = vand.u32 2147483647, %v3360_v52  ;;  %v1295_v58 = vand.u32 2147483648, %v3360_v52 }
  0xec   :  { %v1271_v61 = vsub.f32 1.0, %v1270_v54  ;;  %v1136_v40 = vadd.f32 %v1092_v60, %v899_v48  ;;  %v857_v1 = vpop.f32.mrf.mxu2  ;;  %v1554_v35 = vmul.f32 %v1267_v20, %v3328_v56  ;;  %vm1289_vm0 = vweird.f32 %v3360_v52 }
  0xed   :  { %v900_v17 = vadd.f32 %v857_v1, %v500_v7  ;;  %vm1294_vm3 = vcmp.eq.f32.partialorder %v1293_v12, 8.507059e+37  ;;  %v3404_v11 = vpop.f32.mrf.mxu1 }
  0xee   :  { %v1272_v9 = vmul.f32 %v2605_v50, %v1271_v61  ;;  %v3373_v10 = vadd.f32 %v3317_v44, %v1136_v40  ;;  %v505_v40 = vadd.f32 %v3353_v51, %v3181_v31 }
  0xf0   :  { %v2607_v33 = vpop.eup %2606  ;;  %v1273_v15 = vadd.f32 %v2605_v50, %v1272_v9  ;;  %v2454_v16 = vmul.f32 -1.442695, %v3373_v10 }
  0xf1   :  { %v2609_v18 = vpop.eup %2608  ;;  %v1237_v26 = vadd.f32 1.0, %v2607_v33 }
  0xf2   :  { %v1277_v19 = vsel %vm1276_vm13, %v2605_v50, %v1273_v15  ;;  %2610 = vpow2.f32 %v2454_v16  ;;  %v1285_v27 = vmul.f32 %v2609_v18, %v3360_v52  ;;  %vm1290_vm15 = vweird.f32 %v2609_v18 }
  0xf3   :  { %v1282_v28 = vsel %vm1279_vm14, %v1281_v57, %v1277_v19  ;;  %2612 = vrcp.f32 %v1237_v26  ;;  %v1094_v32 = vpop.f32.mrf.mxu3  ;;  %vm3395_vm1 = vmor %vm1289_vm0, %vm1290_vm15  ;;  %v1308_v5 = vand.u32 2147483647, %v1237_v26  ;;  %v1310_v4 = vand.u32 2147483648, %v1237_v26 }
  0xf4   :  { %v1555_v34 = vmul.f32 %v1282_v28, %v3342_v8  ;;  %v1137_v36 = vadd.f32 %v1094_v32, %v900_v17  ;;  %v860_v37 = vpop.f32.mrf.mxu2  ;;  %v1286_v38 = vsub.f32 1.0, %v1285_v27  ;;  %v1296_v52 = vor.u32 1.1754944e-38, %v1295_v58 }
  0xf5   :  { %v901_v56 = vadd.f32 %v860_v37, %v503_v59  ;;  %vm1304_vm4 = vweird.f32 %v1237_v26  ;;  %v1311_v20 = vor.u32 1.1754944e-38, %v1310_v4  ;;  %vm1309_vm6 = vcmp.eq.f32.partialorder %v1308_v5, 8.507059e+37 }
  0xf6   :  { %v3384_v41 = vadd.f32 %v3317_v44, %v1137_v36  ;;  %v1574_v45 = vpack.c.bf16 %v1555_v34, %v1554_v35  ;;  %v1287_v46 = vmul.f32 %v2609_v18, %v1286_v38  ;;  %v2109_v36 = vld [vmem:[%s4064_s5] sm:$0xff]  ;;  %v508_v37 = vadd.f32 %v3363_v62, %v3179_v29  ;;  %v3428_v29 = vpop.f32.mrf.mxu1 }
  0xf8   :  { %v2611_v48 = vpop.eup %2610  ;;  %v2455_v50 = vmul.f32 -1.442695, %v3384_v41  ;;  %1658 = vmatmul.bf16.vlgmr.msrb.gmra.mxu0 %v1574_v45  ;;  %v1288_v54 = vadd.f32 %v2609_v18, %v1287_v46  ;;  %v2809_v46 = vmov 0  }
  0xf9   :  { %v2613_v53 = vpop.eup %2612  ;;  %v3387_v8 = vadd.f32 1.0, %v2611_v48  ;;  %2590 = vset.pattern.permute.xlu0 %v2809_v46  ;;  %2591 = vset.pattern.permute.xlu1 %v2809_v46 }
  0xfa   :  { %2614 = vpow2.f32 %v2455_v50  ;;  %v1300_v55 = vmul.f32 %v2613_v53, %v1237_v26  ;;  %v1292_v7 = vsel %vm3395_vm1, %v2609_v18, %v1288_v54  ;;  %vm1305_vm2 = vweird.f32 %v2613_v53  ;;  %2121 = vperm.xlu0 %2590, %v2109_v36   ;;  %2592 = vset.pattern.permute.xlu2 %v2809_v46 }
  0xfb   :  { %2616 = vrcp.f32 %v3387_v8  ;;  %v1097_v13 = vpop.f32.mrf.mxu3  ;;  %v1297_v17 = vsel %vm1294_vm3, %v1296_v52, %v1292_v7  ;;  %vm1306_vm5 = vmor %vm1304_vm4, %vm1305_vm2  ;;  %vm1319_vm8 = vweird.f32 %v3387_v8 }
  0xfc   :  { %v1138_v25 = vadd.f32 %v1097_v13, %v901_v56  ;;  %v862_v60 = vpop.f32.mrf.mxu2  ;;  %v1301_v61 = vsub.f32 1.0, %v1300_v55  ;;  %v1556_v26 = vmul.f32 %v1297_v17, %v3350_v24  ;;  %v1323_v55 = vand.u32 2147483647, %v3387_v8 }
  0xfd   :  { %v902_v51 = vadd.f32 %v862_v60, %v505_v40  ;;  %v1325_v13 = vand.u32 2147483648, %v3387_v8  ;;  %v2110_v60 = vld [vmem:[%s4064_s5 + $0x8] sm:$0xff] }
  0xfe   :  { %v3400_v6 = vadd.f32 %v3317_v44, %v1138_v25  ;;  %v1302_v14 = vmul.f32 %v2613_v53, %v1301_v61  ;;  %v510_v61 = vadd.f32 %v3381_v42, %v3199_v49  ;;  %vm1324_vm11 = vcmp.eq.f32.partialorder %v1323_v55, 8.507059e+37  ;;  %v2112_v55 = vld [vmem:[%s4064_s5 + $0x18] sm:$0xff] }
 0x100   :  { %v2615_v9 = vpop.eup %2614  ;;  %v2456_v31 = vmul.f32 -1.442695, %v3400_v6  ;;  %v1303_v33 = vadd.f32 %v2613_v53, %v1302_v14  ;;  %v1326_v14 = vor.u32 1.1754944e-38, %v1325_v13  ;;  %v515_v13 = vadd.f32 %v3428_v29, %v3244_v23 }
 0x101   :  { %v3407_v15 = vpop.eup %2616  ;;  %v3409_v16 = vadd.f32 1.0, %v2615_v9 }
 0x102   :  { %2618 = vpow2.f32 %v2456_v31  ;;  %v1307_v18 = vsel %vm1306_vm5, %v2613_v53, %v1303_v33  ;;  %v1315_v57 = vmul.f32 %v3407_v15, %v3387_v8  ;;  %vm1320_vm7 = vweird.f32 %v3407_v15  ;;  %2126 = vperm.xlu0 %2590, %v2110_v60  }
 0x103   :  { %2620 = vrcp.f32 %v3409_v16  ;;  %v1099_v19 = vpop.f32.mrf.mxu3  ;;  %v1312_v27 = vsel %vm1309_vm6, %v1311_v20, %v1307_v18  ;;  %vm3442_vm9 = vmor %vm1319_vm8, %vm1320_vm7  ;;  %v1338_v1 = vand.u32 2147483647, %v3409_v16  ;;  %v1340_v5 = vand.u32 2147483648, %v3409_v16 }
 0x104   :  { %v1139_v28 = vadd.f32 %v1099_v19, %v902_v51  ;;  %v1557_v32 = vmul.f32 %v1312_v27, %v3357_v30  ;;  %v865_v35 = vpop.f32.mrf.mxu2  ;;  %v1316_v34 = vsub.f32 1.0, %v1315_v57  ;;  %vm1334_vm12 = vweird.f32 %v3409_v16  ;;  %v3463_v19 = vpop.f32.mrf.mxu1 }
 0x105   :  { %v903_v48 = vadd.f32 %v865_v35, %v508_v37  ;;  %v1341_v17 = vor.u32 1.1754944e-38, %v1340_v5  ;;  %vm1339_vm14 = vcmp.eq.f32.partialorder %v1338_v1, 8.507059e+37  ;;  %v2111_v35 = vld [vmem:[%s4064_s5 + $0x10] sm:$0xff] }
 0x106   :  { %v3422_v38 = vadd.f32 %v3317_v44, %v1139_v28  ;;  %v1575_v59 = vpack.c.bf16 %v1557_v32, %v1556_v26  ;;  %v1317_v45 = vmul.f32 %v3407_v15, %v1316_v34  ;;  %2131 = vperm.xlu1 %2591, %v2111_v35   ;;  %v513_v34 = vadd.f32 %v3404_v11, %v3220_v2 }
 0x108   :  { %v2619_v24 = vpop.eup %2618  ;;  %v2457_v30 = vmul.f32 -1.442695, %v3422_v38  ;;  %1663 = vmatmul.bf16.gmra.mxu0 %v1575_v59  ;;  %v1318_v62 = vadd.f32 %v3407_v15, %v1317_v45 }
 0x109   :  { %v2621_v50 = vpop.eup %2620  ;;  %v3426_v56 = vadd.f32 1.0, %v2619_v24 }
 0x10a   :  { %2622 = vpow2.f32 %v2457_v30  ;;  %v1330_v53 = vmul.f32 %v2621_v50, %v3409_v16  ;;  %v1322_v8 = vsel %vm3442_vm9, %v3407_v15, %v1318_v62  ;;  %vm1335_vm10 = vweird.f32 %v2621_v50 }
 0x10b   :  { %2624 = vrcp.f32 %v3426_v56  ;;  %v1102_v54 = vpop.f32.mrf.mxu3  ;;  %v1327_v33 = vsel %vm1324_vm11, %v1326_v14, %v1322_v8  ;;  %vm1336_vm13 = vmor %vm1334_vm12, %vm1335_vm10  ;;  %vm1349_vm0 = vweird.f32 %v3426_v56 }
 0x10c   :  { %v1140_v12 = vadd.f32 %v1102_v54, %v903_v48  ;;  %v867_v58 = vpop.f32.mrf.mxu2  ;;  %v1331_v25 = vsub.f32 1.0, %v1330_v53  ;;  %v1558_v27 = vmul.f32 %v1327_v33, %v3373_v10  ;;  %v1353_v48 = vand.u32 2147483647, %v3426_v56  ;;  %v519_v60 = vpop.f32.mrf.mxu1 }
 0x10d   :  { %v904_v52 = vadd.f32 %v867_v58, %v510_v61 }
 0x10e   :  { %v3449_v4 = vadd.f32 %v3317_v44, %v1140_v12  ;;  %v1332_v7 = vmul.f32 %v2621_v50, %v1331_v25  ;;  %2136 = vperm.xlu1 %2591, %v2112_v55   ;;  %vm1354_vm3 = vcmp.eq.f32.partialorder %v1353_v48, 8.507059e+37 }
 0x110   :  { %v2623_v49 = vpop.eup %2622  ;;  %v2458_v42 = vmul.f32 -1.442695, %v3449_v4  ;;  %v1333_v9 = vadd.f32 %v2621_v50, %v1332_v7 }
 0x111   :  { %v3456_v31 = vpop.eup %2624  ;;  %v3458_v51 = vadd.f32 1.0, %v2623_v49 }
 0x112   :  { %2626 = vpow2.f32 %v2458_v42  ;;  %v1337_v15 = vsel %vm1336_vm13, %v2621_v50, %v1333_v9  ;;  %v1345_v20 = vmul.f32 %v3456_v31, %v3426_v56  ;;  %vm1350_vm15 = vweird.f32 %v3456_v31 }
 0x113   :  { %2628 = vrcp.f32 %v3458_v51  ;;  %v1104_v18 = vpop.f32.mrf.mxu3  ;;  %v1342_v57 = vsel %vm1339_vm14, %v1341_v17, %v1337_v15  ;;  %v1355_v50 = vand.u32 2147483648, %v3426_v56  ;;  %vm3491_vm1 = vmor %vm1349_vm0, %vm1350_vm15  ;;  %v1368_v58 = vand.u32 2147483647, %v3458_v51 }
 0x114   :  { %v1141_v16 = vadd.f32 %v1104_v18, %v904_v52  ;;  %v1559_v28 = vmul.f32 %v1342_v57, %v3384_v41  ;;  %v870_v26 = vpop.f32.mrf.mxu2  ;;  %v1346_v32 = vsub.f32 1.0, %v1345_v20  ;;  %v1370_v25 = vand.u32 2147483648, %v3458_v51 }
 0x115   :  { %v905_v41 = vadd.f32 %v870_v26, %v513_v34  ;;  %v1356_v23 = vor.u32 1.1754944e-38, %v1355_v50  ;;  %vm1364_vm4 = vweird.f32 %v3458_v51  ;;  %vm1369_vm6 = vcmp.eq.f32.partialorder %v1368_v58, 8.507059e+37 }
 0x116   :  { %v3473_v36 = vadd.f32 %v3317_v44, %v1141_v16  ;;  %v1576_v37 = vpack.c.bf16 %v1559_v28, %v1558_v27  ;;  %v1347_v59 = vmul.f32 %v3456_v31, %v1346_v32  ;;  %v1371_v42 = vor.u32 1.1754944e-38, %v1370_v25  ;;  %v522_v32 = vpop.f32.mrf.mxu1 }
 0x117   :  { %v518_v57 = vadd.f32 %v3463_v19, %v3265_v43 }
 0x118   :  { %v2627_v45 = vpop.eup %2626  ;;  %v2459_v10 = vmul.f32 -1.442695, %v3473_v36  ;;  %1668 = vmatmul.bf16.gmra.mxu0 %v1576_v37  ;;  %v1348_v30 = vadd.f32 %v3456_v31, %v1347_v59 }
 0x119   :  { %v2629_v46 = vpop.eup %2628  ;;  %v3477_v24 = vadd.f32 1.0, %v2627_v45 }
 0x11a   :  { %2630 = vpow2.f32 %v2459_v10  ;;  %v1360_v2 = vmul.f32 %v2629_v46, %v3458_v51  ;;  %v1352_v61 = vsel %vm3491_vm1, %v3456_v31, %v1348_v30  ;;  %vm1365_vm2 = vweird.f32 %v2629_v46 }
 0x11b   :  { %2632 = vrcp.f32 %v3477_v24  ;;  %v1107_v11 = vpop.f32.mrf.mxu3  ;;  %v1357_v49 = vsel %vm1354_vm3, %v1356_v23, %v1352_v61  ;;  %vm1366_vm5 = vmor %vm1364_vm4, %vm1365_vm2  ;;  %v1383_v19 = vand.u32 2147483647, %v3477_v24  ;;  %v1385_v45 = vand.u32 2147483648, %v3477_v24 }
 0x11c   :  { %v1142_v62 = vadd.f32 %v1107_v11, %v905_v41  ;;  %v872_v53 = vpop.f32.mrf.mxu2  ;;  %v1361_v54 = vsub.f32 1.0, %v1360_v2  ;;  %v1560_v15 = vmul.f32 %v1357_v49, %v3400_v6  ;;  %vm1379_vm8 = vweird.f32 %v3477_v24 }
 0x11d   :  { %v906_v5 = vadd.f32 %v872_v53, %v515_v13  ;;  %v520_v30 = vadd.f32 %v519_v60, %v3284_v3  ;;  %vm1384_vm11 = vcmp.eq.f32.partialorder %v1383_v19, 8.507059e+37 }
 0x11e   :  { %v3498_v56 = vadd.f32 %v3317_v44, %v1142_v62  ;;  %v1362_v40 = vmul.f32 %v2629_v46, %v1361_v54  ;;  %v524_v61 = vpop.f32.mrf.mxu1 }
 0x120   :  { %v2631_v29 = vpop.eup %2630  ;;  %v2460_v1 = vmul.f32 -1.442695, %v3498_v56  ;;  %v1363_v8 = vadd.f32 %v2629_v46, %v1362_v40 }
 0x121   :  { %v2633_v7 = vpop.eup %2632  ;;  %v3505_v14 = vadd.f32 1.0, %v2631_v29 }
 0x122   :  { %2634 = vpow2.f32 %v2460_v1  ;;  %v1367_v52 = vsel %vm1366_vm5, %v2629_v46, %v1363_v8  ;;  %v1375_v9 = vmul.f32 %v2633_v7, %v3477_v24  ;;  %vm1380_vm7 = vweird.f32 %v2633_v7 }
 0x123   :  { %2636 = vrcp.f32 %v3505_v14  ;;  %v1109_v31 = vpop.f32.mrf.mxu3  ;;  %v1372_v33 = vsel %vm1369_vm6, %v1371_v42, %v1367_v52  ;;  %vm3525_vm9 = vmor %vm1379_vm8, %vm1380_vm7  ;;  %v1398_v11 = vand.u32 2147483647, %v3505_v14  ;;  %v1400_v48 = vand.u32 2147483648, %v3505_v14  ;;  %v2115_v42 = vld [vmem:[%s4064_s5 + $0x30] sm:$0xff] }
 0x124   :  { %v1143_v17 = vadd.f32 %v1109_v31, %v906_v5  ;;  %v1561_v51 = vmul.f32 %v1372_v33, %v3422_v38  ;;  %v875_v20 = vpop.f32.mrf.mxu2  ;;  %v1376_v18 = vsub.f32 1.0, %v1375_v9  ;;  %v1386_v24 = vor.u32 1.1754944e-38, %v1385_v45  ;;  %2151 = vperm.xlu0 %2590, %v2115_v42  }
 0x125   :  { %v907_v34 = vadd.f32 %v875_v20, %v518_v57  ;;  %vm1394_vm12 = vweird.f32 %v3505_v14  ;;  %v1401_v60 = vor.u32 1.1754944e-38, %v1400_v48  ;;  %vm1399_vm14 = vcmp.eq.f32.partialorder %v1398_v11, 8.507059e+37 }
 0x126   :  { %v3514_v16 = vadd.f32 %v3317_v44, %v1143_v17  ;;  %v1577_v27 = vpack.c.bf16 %v1561_v51, %v1560_v15  ;;  %v1377_v28 = vmul.f32 %v2633_v7, %v1376_v18  ;;  %v523_v52 = vadd.f32 %v522_v32, %v3192_v47 }
 0x128   :  { %v2635_v26 = vpop.eup %2634  ;;  %v2461_v35 = vmul.f32 -1.442695, %v3514_v16  ;;  %1673 = vmatmul.bf16.gmra.mxu0 %v1577_v27  ;;  %v1378_v38 = vadd.f32 %v2633_v7, %v1377_v28  ;;  %v527_v28 = vpop.f32.mrf.mxu1 }
 0x129   :  { %v2637_v37 = vpop.eup %2636  ;;  %v3517_v6 = vadd.f32 1.0, %v2635_v26 }
 0x12a   :  { %2638 = vpow2.f32 %v2461_v35  ;;  %v1390_v59 = vmul.f32 %v2637_v37, %v3505_v14  ;;  %v1382_v62 = vsel %vm3525_vm9, %v2633_v7, %v1378_v38  ;;  %vm1395_vm10 = vweird.f32 %v2637_v37 }
 0x12b   :  { %2640 = vrcp.f32 %v3517_v6  ;;  %v1112_v43 = vpop.f32.mrf.mxu3  ;;  %v1387_v25 = vsel %vm1384_vm11, %v1386_v24, %v1382_v62  ;;  %vm1396_vm13 = vmor %vm1394_vm12, %vm1395_vm10  ;;  %v1413_v57 = vand.u32 2147483647, %v3517_v6  ;;  %v1415_v27 = vand.u32 2147483648, %v3517_v6 }
 0x12c   :  { %v1144_v10 = vadd.f32 %v1112_v43, %v907_v34  ;;  %v877_v41 = vpop.f32.mrf.mxu2  ;;  %v1391_v46 = vsub.f32 1.0, %v1390_v59  ;;  %v1562_v8 = vmul.f32 %v1387_v25, %v3449_v4  ;;  %vm1409_vm0 = vweird.f32 %v3517_v6  ;;  %v2113_v34 = vld [vmem:[%s4064_s5 + $0x20] sm:$0xff] }
 0x12d   :  { %v908_v55 = vadd.f32 %v877_v41, %v520_v30  ;;  %v525_v38 = vadd.f32 %v524_v61, %v3213_v63  ;;  %2141 = vperm.xlu2 %2592, %v2113_v34   ;;  %vm1414_vm3 = vcmp.eq.f32.partialorder %v1413_v57, 8.507059e+37  ;;  %v1416_v63 = vor.u32 1.1754944e-38, %v1415_v27  ;;  %v2114_v61 = vld [vmem:[%s4064_s5 + $0x28] sm:$0xff] }
 0x12e   :  { %v3532_v50 = vadd.f32 %v3317_v44, %v1144_v10  ;;  %v1392_v53 = vmul.f32 %v2637_v37, %v1391_v46 }
 0x130   :  { %v2639_v54 = vpop.eup %2638  ;;  %v2462_v3 = vmul.f32 -1.442695, %v3532_v50  ;;  %v1393_v13 = vadd.f32 %v2637_v37, %v1392_v53 }
 0x131   :  { %v3538_v12 = vpop.eup %2640  ;;  %v3540_v58 = vadd.f32 1.0, %v2639_v54 }
 0x132   :  { %2642 = vpow2.f32 %v2462_v3  ;;  %v1397_v40 = vsel %vm1396_vm13, %v2637_v37, %v1393_v13  ;;  %v1405_v23 = vmul.f32 %v3538_v12, %v3517_v6  ;;  %vm1410_vm15 = vweird.f32 %v3538_v12  ;;  %v2116_v37 = vld [vmem:[%s4064_s5 + $0x38] sm:$0xff] }
 0x133   :  { %2644 = vrcp.f32 %v3540_v58  ;;  %v1114_v29 = vpop.f32.mrf.mxu3  ;;  %v1402_v1 = vsel %vm1399_vm14, %v1401_v60, %v1397_v40  ;;  %vm3572_vm1 = vmor %vm1409_vm0, %vm1410_vm15  ;;  %v1428_v43 = vand.u32 2147483647, %v3540_v58  ;;  %v1430_v19 = vand.u32 2147483648, %v3540_v58  ;;  %2156 = vperm.xlu1 %2591, %v2116_v37  }
 0x134   :  { %v1145_v5 = vadd.f32 %v1114_v29, %v908_v55  ;;  %v1563_v7 = vmul.f32 %v1402_v1, %v3473_v36  ;;  %v880_v14 = vpop.f32.mrf.mxu2  ;;  %v1406_v49 = vsub.f32 1.0, %v1405_v23  ;;  %vm1424_vm4 = vweird.f32 %v3540_v58  ;;  %v529_v23 = vpop.f32.mrf.mxu1 }
 0x135   :  { %v909_v36 = vadd.f32 %v880_v14, %v523_v52  ;;  %v1431_v53 = vor.u32 1.1754944e-38, %v1430_v19  ;;  %vm1429_vm6 = vcmp.eq.f32.partialorder %v1428_v43, 8.507059e+37  ;;  %2146 = vperm.xlu2 %2592, %v2114_v61   ;;  %v528_v40 = vadd.f32 %v527_v28, %v3237_v21 }
 0x136   :  { %v3552_v9 = vadd.f32 %v3317_v44, %v1145_v5  ;;  %v1578_v31 = vpack.c.bf16 %v1563_v7, %v1562_v8  ;;  %v1407_v33 = vmul.f32 %v3538_v12, %v1406_v49 }
 0x138   :  { %v2643_v17 = vpop.eup %2642  ;;  %v2463_v4 = vmul.f32 -1.442695, %v3552_v9  ;;  %1678 = vmatmul.bf16.gmra.mxu0 %v1578_v31  ;;  %v1408_v20 = vadd.f32 %v3538_v12, %v1407_v33 }
 0x139   :  { %v2645_v15 = vpop.eup %2644  ;;  %v3556_v51 = vadd.f32 1.0, %v2643_v17 }
 0x13a   :  { %2646 = vpow2.f32 %v2463_v4  ;;  %v1420_v47 = vmul.f32 %v2645_v15, %v3540_v58  ;;  %v1412_v45 = vsel %vm3572_vm1, %v3538_v12, %v1408_v20  ;;  %vm1425_vm2 = vweird.f32 %v2645_v15 }
 0x13b   :  { %2648 = vrcp.f32 %v3556_v51  ;;  %v1117_v18 = vpop.f32.mrf.mxu3  ;;  %v1417_v62 = vsel %vm1414_vm3, %v1416_v63, %v1412_v45  ;;  %vm1426_vm5 = vmor %vm1424_vm4, %vm1425_vm2  ;;  %v1443_v52 = vand.u32 2147483647, %v3556_v51  ;;  %v1445_v31 = vand.u32 2147483648, %v3556_v51 }
 0x13c   :  { %v1146_v26 = vadd.f32 %v1117_v18, %v909_v36  ;;  %v882_v32 = vpop.f32.mrf.mxu2  ;;  %v1421_v35 = vsub.f32 1.0, %v1420_v47  ;;  %v1564_v12 = vmul.f32 %v1417_v62, %v3498_v56  ;;  %vm1439_vm8 = vweird.f32 %v3556_v51  ;;  %v2118_v36 = vld [vmem:[%s4064_s5 + $0x48] sm:$0xff] }
 0x13d   :  { %v910_v30 = vadd.f32 %v882_v32, %v525_v38  ;;  %2166 = vperm.xlu0 %2590, %v2118_v36   ;;  %vm1444_vm11 = vcmp.eq.f32.partialorder %v1443_v52, 8.507059e+37 }
 0x13e   :  { %v3579_v6 = vadd.f32 %v3317_v44, %v1146_v26  ;;  %v1422_v10 = vmul.f32 %v2645_v15, %v1421_v35  ;;  %v532_v26 = vpop.f32.mrf.mxu1 }
 0x140   :  { %v2647_v41 = vpop.eup %2646  ;;  %v2464_v46 = vmul.f32 -1.442695, %v3579_v6  ;;  %v1423_v2 = vadd.f32 %v2645_v15, %v1422_v10 }
 0x141   :  { %v3586_v11 = vpop.eup %2648  ;;  %v3588_v48 = vadd.f32 1.0, %v2647_v41 }
 0x142   :  { %2650 = vpow2.f32 %v2464_v46  ;;  %v1427_v24 = vsel %vm1426_vm5, %v2645_v15, %v1423_v2  ;;  %v1435_v54 = vmul.f32 %v3586_v11, %v3556_v51  ;;  %vm1440_vm7 = vweird.f32 %v3586_v11 }
 0x143   :  { %2652 = vrcp.f32 %v3588_v48  ;;  %v1119_v3 = vpop.f32.mrf.mxu3  ;;  %v1432_v55 = vsel %vm1429_vm6, %v1431_v53, %v1427_v24  ;;  %v530_v15 = vadd.f32 %v529_v23, %v3258_v39  ;;  %vm3617_vm9 = vmor %vm1439_vm8, %vm1440_vm7  ;;  %v1458_v47 = vand.u32 2147483647, %v3588_v48  ;;  %v2117_v23 = vld [vmem:[%s4064_s5 + $0x40] sm:$0xff]  ;;  %s2319_s5 = sshll.u32 %s2811_s11, 4  ;;  %s2320_s5 = int_to_ptr.vmem [resolvable:$true] %s2319_s5 }
 0x144   :  { %v1147_v13 = vadd.f32 %v1119_v3, %v910_v30  ;;  %v1565_v58 = vmul.f32 %v1432_v55, %v3514_v16  ;;  %v885_v25 = vpop.f32.mrf.mxu2  ;;  %v1436_v60 = vsub.f32 1.0, %v1435_v54  ;;  %v1460_v18 = vand.u32 2147483648, %v3588_v48  ;;  %2161 = vperm.xlu2 %2592, %v2117_v23  }
 0x145   :  { %v911_v16 = vadd.f32 %v885_v25, %v528_v40  ;;  %v1446_v39 = vor.u32 1.1754944e-38, %v1445_v31  ;;  %vm1454_vm12 = vweird.f32 %v3588_v48  ;;  %vm1459_vm14 = vcmp.eq.f32.partialorder %v1458_v47, 8.507059e+37 }
 0x146   :  { %v3600_v29 = vadd.f32 %v3317_v44, %v1147_v13  ;;  %v1579_v1 = vpack.c.bf16 %v1565_v58, %v1564_v12  ;;  %v1437_v5 = vmul.f32 %v3586_v11, %v1436_v60  ;;  %v1461_v43 = vor.u32 1.1754944e-38, %v1460_v18 }
 0x148   :  { %v2651_v8 = vpop.eup %2650  ;;  %v2465_v56 = vmul.f32 -1.442695, %v3600_v29  ;;  %1683 = vmatmul.bf16.gmra.mxu0 %v1579_v1  ;;  %v1438_v49 = vadd.f32 %v3586_v11, %v1437_v5 }
 0x149   :  { %v2653_v7 = vpop.eup %2652  ;;  %v3604_v14 = vadd.f32 1.0, %v2651_v8 }
 0x14a   :  { %2654 = vpow2.f32 %v2465_v56  ;;  %v1450_v21 = vmul.f32 %v2653_v7, %v3588_v48  ;;  %v1442_v51 = vsel %vm3617_vm9, %v3586_v11, %v1438_v49  ;;  %vm1455_vm10 = vweird.f32 %v2653_v7 }
 0x14b   :  { %2656 = vrcp.f32 %v3604_v14  ;;  %v1122_v42 = vpop.f32.mrf.mxu3  ;;  %v1447_v59 = vsel %vm1444_vm11, %v1446_v39, %v1442_v51  ;;  %vm1456_vm13 = vmor %vm1454_vm12, %vm1455_vm10  ;;  %v533_v48 = vadd.f32 %v532_v26, %v3279_v0  ;;  %v1473_v25 = vand.u32 2147483647, %v3604_v14 }
 0x14c   :  { %v1148_v33 = vadd.f32 %v1122_v42, %v911_v16  ;;  %v887_v17 = vpop.f32.mrf.mxu2  ;;  %v1451_v4 = vsub.f32 1.0, %v1450_v21  ;;  %v1566_v46 = vmul.f32 %v1447_v59, %v3532_v50  ;;  %v534_v50 = vpop.f32.mrf.mxu1  ;;  %v1475_v60 = vand.u32 2147483648, %v3604_v14 }
 0x14d   :  { %v912_v35 = vadd.f32 %v887_v17, %v530_v15  ;;  %vm1469_vm0 = vweird.f32 %v3604_v14  ;;  %v535_v1 = vadd.f32 %v534_v50, %v3297_v22  ;;  %vm1474_vm3 = vcmp.eq.f32.partialorder %v1473_v25, 8.507059e+37 }
 0x14e   :  { %v3624_v57 = vadd.f32 %v3317_v44, %v1148_v33  ;;  %v1452_v27 = vmul.f32 %v2653_v7, %v1451_v4  ;;  %v1476_v22 = vor.u32 1.1754944e-38, %v1475_v60 }
 0x150   :  { %v2655_v28 = vpop.eup %2654  ;;  %v2466_v32 = vmul.f32 -1.442695, %v3624_v57  ;;  %v1453_v34 = vadd.f32 %v2653_v7, %v1452_v27 }
 0x151   :  { %v2657_v37 = vpop.eup %2656  ;;  %v3631_v38 = vadd.f32 1.0, %v2655_v28  ;;  %v2756_v28 = vld [vmem:[%s4063_s4] ss:$0 sm:$0xff] }
 0x152   :  { %2658 = vpow2.f32 %v2466_v32  ;;  %v1457_v19 = vsel %vm1456_vm13, %v2653_v7, %v1453_v34  ;;  %v1465_v45 = vmul.f32 %v2657_v37, %v3604_v14  ;;  %vm1470_vm15 = vweird.f32 %v2657_v37 }
 0x153   :  { %2660 = vrcp.f32 %v3631_v38  ;;  %v1124_v10 = vpop.f32.mrf.mxu3  ;;  %v1462_v63 = vsel %vm1459_vm14, %v1461_v43, %v1457_v19  ;;  %vm3653_vm1 = vmor %vm1469_vm0, %vm1470_vm15  ;;  %v1488_v56 = vand.u32 2147483647, %v3631_v38  ;;  %v1490_v16 = vand.u32 2147483648, %v3631_v38 }
 0x154   :  { %v1149_v41 = vadd.f32 %v1124_v10, %v912_v35  ;;  %v1567_v30 = vmul.f32 %v1462_v63, %v3552_v9  ;;  %v890_v2 = vpop.f32.mrf.mxu2  ;;  %v1466_v11 = vsub.f32 1.0, %v1465_v45  ;;  %vm1484_vm4 = vweird.f32 %v3631_v38 }
 0x155   :  { %v913_v55 = vadd.f32 %v890_v2, %v533_v48  ;;  %vm1489_vm6 = vcmp.eq.f32.partialorder %v1488_v56, 8.507059e+37 }
 0x156   :  { %v3639_v62 = vadd.f32 %v3317_v44, %v1149_v41  ;;  %v1580_v53 = vpack.c.bf16 %v1567_v30, %v1566_v46  ;;  %v1467_v24 = vmul.f32 %v2657_v37, %v1466_v11 }
 0x158   :  { %v2659_v54 = vpop.eup %2658  ;;  %v2467_v3 = vmul.f32 -1.442695, %v3639_v62  ;;  %1688 = vmatmul.bf16.gmra.mxu0 %v1580_v53  ;;  %v1468_v9 = vadd.f32 %v2657_v37, %v1467_v24 }
 0x159   :  { %v2661_v13 = vpop.eup %2660  ;;  %v3642_v12 = vadd.f32 1.0, %v2659_v54 }
 0x15a   :  { %2662 = vpow2.f32 %v2467_v3  ;;  %v1480_v58 = vmul.f32 %v2661_v13, %v3631_v38  ;;  %v1472_v14 = vsel %vm3653_vm1, %v2657_v37, %v1468_v9  ;;  %vm1485_vm2 = vweird.f32 %v2661_v13  ;;  %v3687_v3 = vld [vmem:[%s4063_s4 + $0x1] ss:$0 sm:$0xff] }
 0x15b   :  { %2664 = vrcp.f32 %v3642_v12  ;;  %v1127_v0 = vpop.f32.mrf.mxu3  ;;  %v1477_v4 = vsel %vm1474_vm3, %v1476_v22, %v1472_v14  ;;  %vm1486_vm5 = vmor %vm1484_vm4, %vm1485_vm2  ;;  %vm1499_vm8 = vweird.f32 %v3642_v12  ;;  %v1503_v45 = vand.u32 2147483647, %v3642_v12 }
 0x15c   :  { %v1150_v61 = vadd.f32 %v1127_v0, %v913_v55  ;;  %v1481_v40 = vsub.f32 1.0, %v1480_v58  ;;  %v892_v5 = vpop.f32.mrf.mxu2  ;;  %v1568_v51 = vmul.f32 %v1477_v4, %v3579_v6 }
 0x15d   :  { %v914_v52 = vadd.f32 %v892_v5, %v535_v1  ;;  %vm1504_vm12 = vcmp.eq.f32.partialorder %v1503_v45, 8.507059e+37 }
 0x15e   :  { %v3660_v7 = vadd.f32 %v3317_v44, %v1150_v61  ;;  %v1482_v49 = vmul.f32 %v2661_v13, %v1481_v40  ;;  %v1491_v44 = vor.u32 1.1754944e-38, %v1490_v16 }
 0x160   :  { %v2663_v21 = vpop.eup %2662  ;;  %v2468_v42 = vmul.f32 -1.442695, %v3660_v7  ;;  %v1483_v31 = vadd.f32 %v2661_v13, %v1482_v49 }
 0x161   :  { %v2665_v33 = vpop.eup %2664  ;;  %v1251_v17 = vadd.f32 1.0, %v2663_v21 }
 0x162   :  { %2666 = vpow2.f32 %v2468_v42  ;;  %v1487_v36 = vsel %vm1486_vm5, %v2661_v13, %v1483_v31  ;;  %v1495_v15 = vmul.f32 %v2665_v33, %v3642_v12  ;;  %vm1500_vm7 = vweird.f32 %v2665_v33 }
 0x163   :  { %2668 = vrcp.f32 %v1251_v17  ;;  %v1129_v20 = vpop.f32.mrf.mxu3  ;;  %v1492_v47 = vsel %vm1489_vm6, %v1491_v44, %v1487_v36  ;;  %vm3678_vm9 = vmor %vm1499_vm8, %vm1500_vm7  ;;  %v1520_v41 = vand.u32 2147483648, %v1251_v17  ;;  %v1518_v30 = vand.u32 2147483647, %v1251_v17 }
 0x164   :  { %v1151_v18 = vadd.f32 %v1129_v20, %v914_v52  ;;  %v1569_v27 = vmul.f32 %v1492_v47, %v3600_v29  ;;  %v1496_v39 = vsub.f32 1.0, %v1495_v15  ;;  %v1505_v29 = vand.u32 2147483648, %v3642_v12 }
 0x165   :  { %vm1514_vm11 = vweird.f32 %v1251_v17  ;;  %v1521_v12 = vor.u32 1.1754944e-38, %v1520_v41  ;;  %vm1519_vm14 = vcmp.eq.f32.partialorder %v1518_v30, 8.507059e+37 }
 0x166   :  { %v3672_v26 = vadd.f32 %v2756_v28, %v1151_v18  ;;  %v1581_v32 = vpack.c.bf16 %v1569_v27, %v1568_v51  ;;  %v1497_v35 = vmul.f32 %v2665_v33, %v1496_v39  ;;  %v1506_v11 = vor.u32 1.1754944e-38, %v1505_v29 }
 0x168   :  { %v2667_v34 = vpop.eup %2666  ;;  %v2469_v37 = vmul.f32 -1.442695, %v3672_v26  ;;  %1693 = vmatmul.bf16.gmra.mxu0 %v1581_v32  ;;  %v1498_v6 = vadd.f32 %v2665_v33, %v1497_v35 }
 0x169   :  { %v2669_v38 = vpop.eup %2668  ;;  %v1252_v59 = vadd.f32 1.0, %v2667_v34 }
 0x16a   :  { %2670 = vpow2.f32 %v2469_v37  ;;  %v1510_v43 = vmul.f32 %v2669_v38, %v1251_v17  ;;  %vm1515_vm10 = vweird.f32 %v2669_v38  ;;  %v1502_v46 = vsel %vm3678_vm9, %v2665_v33, %v1498_v6 }
 0x16b   :  { %2672 = vrcp.f32 %v1252_v59  ;;  %vm1516_vm13 = vmor %vm1514_vm11, %vm1515_vm10  ;;  %v1507_v55 = vsel %vm1504_vm12, %v1506_v11, %v1502_v46  ;;  %v1535_v56 = vand.u32 2147483648, %v1252_v59  ;;  %vm1529_vm0 = vweird.f32 %v1252_v59 }
 0x16c   :  { %v1511_v19 = vsub.f32 1.0, %v1510_v43  ;;  %v1570_v0 = vmul.f32 %v1507_v55, %v3624_v57  ;;  %v1533_v16 = vand.u32 2147483647, %v1252_v59  ;;  %v3709_v41 = vpop.permute.xlu0 %2121 }
 0x16d   :  { %v1536_v52 = vor.u32 1.1754944e-38, %v1535_v56 }
 0x16e   :  { %v1512_v63 = vmul.f32 %v2669_v38, %v1511_v19  ;;  %vm1534_vm3 = vcmp.eq.f32.partialorder %v1533_v16, 8.507059e+37 }
 0x170   :  { %v2671_v2 = vpop.eup %2670  ;;  %v1513_v48 = vadd.f32 %v2669_v38, %v1512_v63 }
 0x171   :  { %v2673_v53 = vpop.eup %2672  ;;  %v1253_v24 = vadd.f32 1.0, %v2671_v2 }
 0x172   :  { %v1525_v54 = vmul.f32 %v2673_v53, %v1252_v59  ;;  %v1517_v13 = vsel %vm1516_vm13, %v2669_v38, %v1513_v48  ;;  %vm1530_vm15 = vweird.f32 %v2673_v53 }
 0x173   :  { %2674 = vrcp.f32 %v1253_v24  ;;  %v1522_v9 = vsel %vm1519_vm14, %v1521_v12, %v1517_v13  ;;  %vm1531_vm1 = vmor %vm1529_vm0, %vm1530_vm15  ;;  %v1548_v57 = vand.u32 2147483647, %v1253_v24  ;;  %vm1544_vm4 = vweird.f32 %v1253_v24 }
 0x174   :  { %v1526_v50 = vsub.f32 1.0, %v1525_v54  ;;  %v1571_v25 = vmul.f32 %v1522_v9, %v3639_v62  ;;  %v1550_v62 = vand.u32 2147483648, %v1253_v24 }
 0x175   :  { %v1659_v58 = vpop.f32.mrf.mxu0  ;;  %vm1549_vm6 = vcmp.eq.f32.partialorder %v1548_v57, 8.507059e+37 }
 0x176   :  { %v1527_v60 = vmul.f32 %v2673_v53, %v1526_v50  ;;  %v3692_v61 = vadd.f32 %v3687_v3, %v1659_v58  ;;  %v1582_v40 = vpack.c.bf16 %v1571_v25, %v1570_v0  ;;  %v1551_v44 = vor.u32 1.1754944e-38, %v1550_v62 }
 0x178   :  { %v2502_v23 = vmul.f32 -1.442695, %v3692_v61  ;;  %1698 = vmatmul.bf16.gmra.mxu0 %v1582_v40  ;;  %v1528_v5 = vadd.f32 %v2673_v53, %v1527_v60 }
 0x179   :  { %v2675_v1 = vpop.eup %2674 }
 0x17a   :  { %v1540_v8 = vmul.f32 %v2675_v1, %v1253_v24  ;;  %2676 = vpow2.f32 %v2502_v23  ;;  %v1532_v22 = vsel %vm1531_vm1, %v2673_v53, %v1528_v5  ;;  %vm1545_vm2 = vweird.f32 %v2675_v1  ;;  %v3716_v5 = vpop.permute.xlu0 %2126 }
 0x17b   :  { %v1537_v4 = vsel %vm1534_vm3, %v1536_v52, %v1532_v22  ;;  %vm1546_vm5 = vmor %vm1544_vm4, %vm1545_vm2 }
 0x17c   :  { %v1541_v14 = vsub.f32 1.0, %v1540_v8  ;;  %v1572_v47 = vmul.f32 %v1537_v4, %v3660_v7 }
 0x17d   :  { %v1661_v49 = vpop.f32.mrf.mxu0 }
 0x17e   :  { %v1542_v21 = vmul.f32 %v2675_v1, %v1541_v14  ;;  %v3696_v42 = vadd.f32 %v3687_v3, %v1661_v49 }
 0x180   :  { %v2677_v31 = vpop.eup %2676  ;;  %v1543_v33 = vadd.f32 %v2675_v1, %v1542_v21  ;;  %v2503_v17 = vmul.f32 -1.442695, %v3696_v42 }
 0x181   :  { %v1769_v36 = vadd.f32 1.0, %v2677_v31 }
 0x182   :  { %v1547_v15 = vsel %vm1546_vm5, %v2675_v1, %v1543_v33  ;;  %2678 = vpow2.f32 %v2503_v17 }
 0x183   :  { %v1552_v20 = vsel %vm1549_vm6, %v1551_v44, %v1547_v15  ;;  %2680 = vrcp.f32 %v1769_v36  ;;  %v1800_v29 = vand.u32 2147483648, %v1769_v36  ;;  %vm1794_vm8 = vweird.f32 %v1769_v36  ;;  %v3725_v44 = vpop.permute.xlu1 %2131 }
 0x184   :  { %v1573_v18 = vmul.f32 %v1552_v20, %v3672_v26  ;;  %v1798_v10 = vand.u32 2147483647, %v1769_v36 }
 0x185   :  { %v1664_v51 = vpop.f32.mrf.mxu0  ;;  %v1801_v2 = vor.u32 1.1754944e-38, %v1800_v29 }
 0x186   :  { %v3702_v27 = vadd.f32 %v3687_v3, %v1664_v51  ;;  %v1583_v39 = vpack.c.bf16 %v1573_v18, %v1572_v47  ;;  %vm1799_vm10 = vcmp.eq.f32.partialorder %v1798_v10, 8.507059e+37  ;;  %v2583_v51 = vld [vmem:[%s4062_s3 + $0x38] sm:$0xff] }
 0x187   :  { %2300 = vmatpush.bf16.msra.mxu1 %v2583_v51 }
 0x188   :  { %v2679_v28 = vpop.eup %2678  ;;  %v2504_v32 = vmul.f32 -1.442695, %v3702_v27  ;;  %1703 = vmatmul.bf16.gmra.mxu0 %v1583_v39 }
 0x189   :  { %v2681_v35 = vpop.eup %2680  ;;  %v1770_v34 = vadd.f32 1.0, %v2679_v28 }
 0x18a   :  { %v1790_v37 = vmul.f32 %v2681_v35, %v1769_v36  ;;  %2682 = vpow2.f32 %v2504_v32  ;;  %vm1795_vm7 = vweird.f32 %v2681_v35 }
 0x18b   :  { %2684 = vrcp.f32 %v1770_v34  ;;  %vm1796_vm9 = vmor %vm1794_vm8, %vm1795_vm7  ;;  %v1813_v48 = vand.u32 2147483647, %v1770_v34  ;;  %v1815_v53 = vand.u32 2147483648, %v1770_v34  ;;  %vm1809_vm12 = vweird.f32 %v1770_v34 }
 0x18c   :  { %v1791_v38 = vsub.f32 1.0, %v1790_v37 }
 0x18d   :  { %v1666_v59 = vpop.f32.mrf.mxu0  ;;  %v1816_v25 = vor.u32 1.1754944e-38, %v1815_v53  ;;  %vm1814_vm14 = vcmp.eq.f32.partialorder %v1813_v48, 8.507059e+37 }
 0x18e   :  { %v1792_v43 = vmul.f32 %v2681_v35, %v1791_v38  ;;  %v3706_v7 = vadd.f32 %v3687_v3, %v1666_v59 }
 0x190   :  { %v2683_v26 = vpop.eup %2682  ;;  %v1793_v6 = vadd.f32 %v2681_v35, %v1792_v43  ;;  %v2505_v19 = vmul.f32 -1.442695, %v3706_v7 }
 0x191   :  { %v2685_v45 = vpop.eup %2684  ;;  %v1771_v63 = vadd.f32 1.0, %v2683_v26 }
 0x192   :  { %v1805_v46 = vmul.f32 %v2685_v45, %v1770_v34  ;;  %2686 = vpow2.f32 %v2505_v19  ;;  %v1797_v30 = vsel %vm1796_vm9, %v2681_v35, %v1793_v6  ;;  %vm1810_vm11 = vweird.f32 %v2685_v45 }
 0x193   :  { %2688 = vrcp.f32 %v1771_v63  ;;  %v1802_v54 = vsel %vm1799_vm10, %v1801_v2, %v1797_v30  ;;  %vm1811_vm13 = vmor %vm1809_vm12, %vm1810_vm11  ;;  %v1828_v16 = vand.u32 2147483647, %v1771_v63  ;;  %v1830_v14 = vand.u32 2147483648, %v1771_v63 }
 0x194   :  { %v1806_v11 = vsub.f32 1.0, %v1805_v46  ;;  %v2089_v0 = vmul.f32 %v1802_v54, %v3692_v61  ;;  %vm1824_vm0 = vweird.f32 %v1771_v63  ;;  %v3739_v46 = vpop.permute.xlu1 %2136 }
 0x195   :  { %v1669_v24 = vpop.f32.mrf.mxu0  ;;  %v1831_v17 = vor.u32 1.1754944e-38, %v1830_v14  ;;  %vm1829_vm2 = vcmp.eq.f32.partialorder %v1828_v16, 8.507059e+37 }
 0x196   :  { %v1807_v55 = vmul.f32 %v2685_v45, %v1806_v11  ;;  %v3712_v13 = vadd.f32 %v3687_v3, %v1669_v24  ;;  %v2169_v57 = vmul.f32 %v3709_v41, %v2089_v0 }
 0x198   :  { %v2687_v12 = vpop.eup %2686  ;;  %v1808_v50 = vadd.f32 %v2685_v45, %v1807_v55  ;;  %v2506_v9 = vmul.f32 -1.442695, %v3712_v13 }
 0x199   :  { %v2689_v58 = vpop.eup %2688  ;;  %v1772_v60 = vadd.f32 1.0, %v2687_v12 }
 0x19a   :  { %v1812_v40 = vsel %vm1811_vm13, %v2685_v45, %v1808_v50  ;;  %v1820_v23 = vmul.f32 %v2689_v58, %v1771_v63  ;;  %2690 = vpow2.f32 %v2506_v9  ;;  %vm1825_vm15 = vweird.f32 %v2689_v58 }
 0x19b   :  { %v1817_v1 = vsel %vm1814_vm14, %v1816_v25, %v1812_v40  ;;  %2692 = vrcp.f32 %v1772_v60  ;;  %vm1826_vm1 = vmor %vm1824_vm0, %vm1825_vm15  ;;  %v1843_v39 = vand.u32 2147483647, %v1772_v60  ;;  %v1845_v28 = vand.u32 2147483648, %v1772_v60 }
 0x19c   :  { %v2090_v8 = vmul.f32 %v1817_v1, %v3696_v42  ;;  %v1821_v56 = vsub.f32 1.0, %v1820_v23  ;;  %vm1839_vm4 = vweird.f32 %v1772_v60 }
 0x19d   :  { %v1671_v62 = vpop.f32.mrf.mxu0  ;;  %v1846_v29 = vor.u32 1.1754944e-38, %v1845_v28  ;;  %vm1844_vm6 = vcmp.eq.f32.partialorder %v1843_v39, 8.507059e+37 }
 0x19e   :  { %v1822_v61 = vmul.f32 %v2689_v58, %v1821_v56  ;;  %v2170_v49 = vmul.f32 %v3716_v5, %v2090_v8  ;;  %v3722_v22 = vadd.f32 %v3687_v3, %v1671_v62 }
 0x1a0   :  { %v2691_v21 = vpop.eup %2690  ;;  %v1823_v52 = vadd.f32 %v2689_v58, %v1822_v61  ;;  %v2189_v31 = vadd.f32 %v2170_v49, %v2169_v57  ;;  %v2507_v33 = vmul.f32 -1.442695, %v3722_v22 }
 0x1a1   :  { %v2693_v42 = vpop.eup %2692  ;;  %v1773_v4 = vadd.f32 1.0, %v2691_v21 }
 0x1a2   :  { %v1827_v36 = vsel %vm1826_vm1, %v2689_v58, %v1823_v52  ;;  %v1835_v15 = vmul.f32 %v2693_v42, %v1772_v60  ;;  %2694 = vpow2.f32 %v2507_v33  ;;  %vm1840_vm3 = vweird.f32 %v2693_v42  ;;  %v3747_v60 = vpop.permute.xlu2 %2141 }
 0x1a3   :  { %v1832_v20 = vsel %vm1829_vm2, %v1831_v17, %v1827_v36  ;;  %2696 = vrcp.f32 %v1773_v4  ;;  %vm1841_vm5 = vmor %vm1839_vm4, %vm1840_vm3  ;;  %v1858_v11 = vand.u32 2147483647, %v1773_v4  ;;  %v1860_v48 = vand.u32 2147483648, %v1773_v4 }
 0x1a4   :  { %v2091_v47 = vmul.f32 %v1832_v20, %v3702_v27  ;;  %v1836_v18 = vsub.f32 1.0, %v1835_v15  ;;  %v2582_v27 = vld [vmem:[%s4062_s3 + $0x30] sm:$0xff]  ;;  %vm1854_vm8 = vweird.f32 %v1773_v4 }
 0x1a5   :  { %v1674_v32 = vpop.f32.mrf.mxu0  ;;  %2301 = vmatpush.bf16.msra.mxu1 %v2582_v27  ;;  %vm1859_vm10 = vcmp.eq.f32.partialorder %v1858_v11, 8.507059e+37 }
 0x1a6   :  { %v1837_v35 = vmul.f32 %v2693_v42, %v1836_v18  ;;  %v2171_v34 = vmul.f32 %v3725_v44, %v2091_v47  ;;  %v3733_v37 = vadd.f32 %v3687_v3, %v1674_v32 }
 0x1a8   :  { %v2695_v38 = vpop.eup %2694  ;;  %v1838_v59 = vadd.f32 %v2693_v42, %v1837_v35  ;;  %v2190_v43 = vadd.f32 %v2189_v31, %v2171_v34  ;;  %v2508_v26 = vmul.f32 -1.442695, %v3733_v37 }
 0x1a9   :  { %v2697_v6 = vpop.eup %2696  ;;  %v1774_v19 = vadd.f32 1.0, %v2695_v38 }
 0x1aa   :  { %v1842_v45 = vsel %vm1841_vm5, %v2693_v42, %v1838_v59  ;;  %v1850_v10 = vmul.f32 %v2697_v6, %v1773_v4  ;;  %2698 = vpow2.f32 %v2508_v26  ;;  %vm1855_vm7 = vweird.f32 %v2697_v6  ;;  %v3755_v20 = vpop.permute.xlu2 %2146 }
 0x1ab   :  { %v1847_v63 = vsel %vm1844_vm6, %v1846_v29, %v1842_v45  ;;  %2700 = vrcp.f32 %v1774_v19  ;;  %vm1856_vm9 = vmor %vm1854_vm8, %vm1855_vm7  ;;  %v1873_v16 = vand.u32 2147483647, %v1774_v19  ;;  %v1875_v14 = vand.u32 2147483648, %v1774_v19 }
 0x1ac   :  { %v2092_v30 = vmul.f32 %v1847_v63, %v3706_v7  ;;  %v1851_v2 = vsub.f32 1.0, %v1850_v10  ;;  %v1861_v7 = vor.u32 1.1754944e-38, %v1860_v48  ;;  %vm1869_vm12 = vweird.f32 %v1774_v19  ;;  %v3763_v10 = vpop.permute.xlu0 %2151 }
 0x1ad   :  { %v1676_v53 = vpop.f32.mrf.mxu0  ;;  %vm1874_vm14 = vcmp.eq.f32.partialorder %v1873_v16, 8.507059e+37 }
 0x1ae   :  { %v1852_v24 = vmul.f32 %v2697_v6, %v1851_v2  ;;  %v2172_v54 = vmul.f32 %v3739_v46, %v2092_v30  ;;  %v3744_v55 = vadd.f32 %v3687_v3, %v1676_v53 }
 0x1b0   :  { %v2699_v12 = vpop.eup %2698  ;;  %v1853_v50 = vadd.f32 %v2697_v6, %v1852_v24  ;;  %v2191_v9 = vadd.f32 %v2190_v43, %v2172_v54  ;;  %v2509_v58 = vmul.f32 -1.442695, %v3744_v55 }
 0x1b1   :  { %v2701_v0 = vpop.eup %2700  ;;  %v1775_v25 = vadd.f32 1.0, %v2699_v12 }
 0x1b2   :  { %v1857_v40 = vsel %vm1856_vm9, %v2697_v6, %v1853_v50  ;;  %v1865_v23 = vmul.f32 %v2701_v0, %v1774_v19  ;;  %2702 = vpow2.f32 %v2509_v58  ;;  %vm1870_vm11 = vweird.f32 %v2701_v0 }
 0x1b3   :  { %v1862_v1 = vsel %vm1859_vm10, %v1861_v7, %v1857_v40  ;;  %2704 = vrcp.f32 %v1775_v25  ;;  %vm1871_vm13 = vmor %vm1869_vm12, %vm1870_vm11  ;;  %v1888_v51 = vand.u32 2147483647, %v1775_v25  ;;  %v1890_v39 = vand.u32 2147483648, %v1775_v25 }
 0x1b4   :  { %v2093_v8 = vmul.f32 %v1862_v1, %v3712_v13  ;;  %v1866_v56 = vsub.f32 1.0, %v1865_v23  ;;  %v1876_v13 = vor.u32 1.1754944e-38, %v1875_v14  ;;  %vm1884_vm0 = vweird.f32 %v1775_v25 }
 0x1b5   :  { %v1679_v57 = vpop.f32.mrf.mxu0  ;;  %vm1889_vm2 = vcmp.eq.f32.partialorder %v1888_v51, 8.507059e+37 }
 0x1b6   :  { %v1867_v62 = vmul.f32 %v2701_v0, %v1866_v56  ;;  %v2173_v61 = vmul.f32 %v3747_v60, %v2093_v8  ;;  %v3752_v49 = vadd.f32 %v3687_v3, %v1679_v57 }
 0x1b8   :  { %v2703_v21 = vpop.eup %2702  ;;  %v1868_v52 = vadd.f32 %v2701_v0, %v1867_v62  ;;  %v2192_v31 = vadd.f32 %v2191_v9, %v2173_v61  ;;  %v2510_v33 = vmul.f32 -1.442695, %v3752_v49  ;;  %v2581_v61 = vld [vmem:[%s4062_s3 + $0x28] sm:$0xff] }
 0x1b9   :  { %v2705_v42 = vpop.eup %2704  ;;  %v1776_v17 = vadd.f32 1.0, %v2703_v21  ;;  %2302 = vmatpush.bf16.msra.mxu1 %v2581_v61 }
 0x1ba   :  { %v1872_v4 = vsel %vm1871_vm13, %v2701_v0, %v1868_v52  ;;  %v1880_v36 = vmul.f32 %v2705_v42, %v1775_v25  ;;  %2706 = vpow2.f32 %v2510_v33  ;;  %vm1885_vm15 = vweird.f32 %v2705_v42 }
 0x1bb   :  { %v1877_v15 = vsel %vm1874_vm14, %v1876_v13, %v1872_v4  ;;  %2708 = vrcp.f32 %v1776_v17  ;;  %vm1886_vm1 = vmor %vm1884_vm0, %vm1885_vm15  ;;  %v1905_v11 = vand.u32 2147483648, %v1776_v17  ;;  %v1903_v24 = vand.u32 2147483647, %v1776_v17 }
 0x1bc   :  { %v2094_v47 = vmul.f32 %v1877_v15, %v3722_v22  ;;  %v1881_v18 = vsub.f32 1.0, %v1880_v36  ;;  %v1891_v22 = vor.u32 1.1754944e-38, %v1890_v39  ;;  %vm1899_vm4 = vweird.f32 %v1776_v17 }
 0x1bd   :  { %v1681_v28 = vpop.f32.mrf.mxu0  ;;  %v1906_v0 = vor.u32 1.1754944e-38, %v1905_v11  ;;  %vm1904_vm6 = vcmp.eq.f32.partialorder %v1903_v24, 8.507059e+37 }
 0x1be   :  { %v1882_v32 = vmul.f32 %v2705_v42, %v1881_v18  ;;  %v2174_v35 = vmul.f32 %v3755_v20, %v2094_v47  ;;  %v3760_v34 = vadd.f32 %v3687_v3, %v1681_v28 }
 0x1c0   :  { %v2707_v27 = vpop.eup %2706  ;;  %v1883_v38 = vadd.f32 %v2705_v42, %v1882_v32  ;;  %v2193_v59 = vadd.f32 %v2192_v31, %v2174_v35  ;;  %v2511_v43 = vmul.f32 -1.442695, %v3760_v34 }
 0x1c1   :  { %v2709_v26 = vpop.eup %2708  ;;  %v1777_v6 = vadd.f32 1.0, %v2707_v27 }
 0x1c2   :  { %v1887_v29 = vsel %vm1886_vm1, %v2705_v42, %v1883_v38  ;;  %2710 = vpow2.f32 %v2511_v43  ;;  %v1895_v19 = vmul.f32 %v2709_v26, %v1776_v17  ;;  %vm1900_vm3 = vweird.f32 %v2709_v26  ;;  %v3774_v42 = vpop.permute.xlu2 %2161 }
 0x1c3   :  { %v1892_v45 = vsel %vm1889_vm2, %v1891_v22, %v1887_v29  ;;  %2712 = vrcp.f32 %v1777_v6  ;;  %vm1901_vm5 = vmor %vm1899_vm4, %vm1900_vm3  ;;  %v1920_v14 = vand.u32 2147483648, %v1777_v6  ;;  %v1918_v57 = vand.u32 2147483647, %v1777_v6 }
 0x1c4   :  { %v2095_v63 = vmul.f32 %v1892_v45, %v3733_v37  ;;  %v1896_v30 = vsub.f32 1.0, %v1895_v19  ;;  %v3767_v37 = vpop.permute.xlu1 %2156  ;;  %vm1914_vm8 = vweird.f32 %v1777_v6  ;;  %v2580_v19 = vld [vmem:[%s4062_s3 + $0x20] sm:$0xff] }
 0x1c5   :  { %v1684_v2 = vpop.f32.mrf.mxu0  ;;  %vm1919_vm10 = vcmp.eq.f32.partialorder %v1918_v57, 8.507059e+37  ;;  %2303 = vmatpush.bf16.msra.mxu1 %v2580_v19 }
 0x1c6   :  { %v2175_v48 = vmul.f32 %v3763_v10, %v2095_v63  ;;  %v1897_v53 = vmul.f32 %v2709_v26, %v1896_v30  ;;  %v3779_v28 = vadd.f32 %v3687_v3, %v1684_v2 }
 0x1c8   :  { %v2711_v54 = vpop.eup %2710  ;;  %v2194_v12 = vadd.f32 %v2193_v59, %v2175_v48  ;;  %v1898_v50 = vadd.f32 %v2709_v26, %v1897_v53  ;;  %v2512_v43 = vmul.f32 -1.442695, %v3779_v28 }
 0x1c9   :  { %v2713_v9 = vpop.eup %2712  ;;  %v1778_v58 = vadd.f32 1.0, %v2711_v54 }
 0x1ca   :  { %v1902_v7 = vsel %vm1901_vm5, %v2709_v26, %v1898_v50  ;;  %v1910_v25 = vmul.f32 %v2713_v9, %v1777_v6  ;;  %vm1915_vm7 = vweird.f32 %v2713_v9 }
 0x1cb   :  { %2714 = vrcp.f32 %v1778_v58  ;;  %v1907_v40 = vsel %vm1904_vm6, %v1906_v0, %v1902_v7  ;;  %vm1916_vm9 = vmor %vm1914_vm8, %vm1915_vm7  ;;  %v1935_v47 = vand.u32 2147483648, %v1778_v58  ;;  %v1933_v51 = vand.u32 2147483647, %v1778_v58 }
 0x1cc   :  { %v2096_v23 = vmul.f32 %v1907_v40, %v3744_v55  ;;  %v1911_v1 = vsub.f32 1.0, %v1910_v25  ;;  %v1921_v55 = vor.u32 1.1754944e-38, %v1920_v14  ;;  %vm1929_vm12 = vweird.f32 %v1778_v58 }
 0x1cd   :  { %v1686_v8 = vpop.f32.mrf.mxu0  ;;  %v1936_v38 = vor.u32 1.1754944e-38, %v1935_v47  ;;  %vm1934_vm14 = vcmp.eq.f32.partialorder %v1933_v51, 8.507059e+37  ;;  %2716 = vpow2.f32 %v2512_v43 }
 0x1ce   :  { %v2176_v56 = vmul.f32 %v3767_v37, %v2096_v23  ;;  %v1912_v16 = vmul.f32 %v2713_v9, %v1911_v1  ;;  %v3782_v35 = vadd.f32 %v3687_v3, %v1686_v8 }
 0x1d0   :  { %v2195_v62 = vadd.f32 %v2194_v12, %v2176_v56  ;;  %v1913_v21 = vadd.f32 %v2713_v9, %v1912_v16  ;;  %v2513_v6 = vmul.f32 -1.442695, %v3782_v35 }
 0x1d1   :  { %v2715_v52 = vpop.eup %2714 }
 0x1d2   :  { %v1917_v31 = vsel %vm1916_vm9, %v2713_v9, %v1913_v21  ;;  %v1925_v33 = vmul.f32 %v2715_v52, %v1778_v58  ;;  %vm1930_vm11 = vweird.f32 %v2715_v52  ;;  %2718 = vpow2.f32 %v2513_v6  ;;  %v2579_v21 = vld [vmem:[%s4062_s3 + $0x18] sm:$0xff] }
 0x1d3   :  { %v1922_v13 = vsel %vm1919_vm10, %v1921_v55, %v1917_v31  ;;  %vm1931_vm13 = vmor %vm1929_vm12, %vm1930_vm11  ;;  %v2717_v11 = vpop.eup %2716  ;;  %2304 = vmatpush.bf16.msra.mxu1 %v2579_v21 }
 0x1d4   :  { %v1926_v17 = vsub.f32 1.0, %v1925_v33  ;;  %v2097_v4 = vmul.f32 %v1922_v13, %v3752_v49  ;;  %v3784_v49 = vpop.permute.xlu0 %2166  ;;  %v3803_v24 = vadd.f32 1.0, %v2717_v11 }
 0x1d5   :  { %v1689_v36 = vpop.f32.mrf.mxu0 }
 0x1d6   :  { %v1927_v15 = vmul.f32 %v2715_v52, %v1926_v17  ;;  %v2177_v18 = vmul.f32 %v3774_v42, %v2097_v4  ;;  %v3794_v45 = vadd.f32 %v3687_v3, %v1689_v36  ;;  %vm1944_vm1 = vweird.f32 %v3803_v24 }
 0x1d8   :  { %v1928_v39 = vadd.f32 %v2715_v52, %v1927_v15  ;;  %v2196_v32 = vadd.f32 %v2195_v62, %v2177_v18  ;;  %v2514_v30 = vmul.f32 -1.442695, %v3794_v45  ;;  %v2719_v48 = vpop.eup %2718 }
 0x1d9   :  { %v3808_v12 = vadd.f32 1.0, %v2719_v48 }
 0x1da   :  { %v1932_v27 = vsel %vm1931_vm13, %v2715_v52, %v1928_v39  ;;  %2720 = vpow2.f32 %v2514_v30 }
 0x1db   :  { %v1937_v59 = vsel %vm1934_vm14, %v1936_v38, %v1932_v27  ;;  %v1963_v19 = vand.u32 2147483647, %v3808_v12  ;;  %v1965_v30 = vand.u32 2147483648, %v3808_v12  ;;  %vm1959_vm3 = vweird.f32 %v3808_v12 }
 0x1dc   :  { %v2098_v26 = vmul.f32 %v1937_v59, %v3760_v34 }
 0x1dd   :  { %v1691_v22 = vpop.f32.mrf.mxu0  ;;  %vm1964_vm6 = vcmp.eq.f32.partialorder %v1963_v19, 8.507059e+37 }
 0x1de   :  { %v2178_v29 = vmul.f32 %v3784_v49, %v2098_v26  ;;  %v3800_v34 = vadd.f32 %v3687_v3, %v1691_v22  ;;  %v1950_v26 = vand.u32 2147483648, %v3803_v24 }
 0x1e0   :  { %v3796_v63 = vadd.f32 %v2196_v32, %v2178_v29  ;;  %v2515_v53 = vmul.f32 -1.442695, %v3800_v34  ;;  %v2721_v58 = vpop.eup %2720  ;;  %v1948_v29 = vand.u32 2147483647, %v3803_v24 }
 0x1e1   :  { %v3817_v25 = vadd.f32 1.0, %v2721_v58 }
 0x1e2   :  { %2722 = vpow2.f32 %v2515_v53  ;;  %vm1949_vm5 = vcmp.eq.f32.partialorder %v1948_v29, 8.507059e+37 }
 0x1e3   :  { %2724 = vrcp.f32 %v3803_v24  ;;  %vm1974_vm8 = vweird.f32 %v3817_v25 }
 0x1e4   :  { %2726 = vrcp.f32 %v3808_v12 }
 0x1e5   :  { %v1694_v2 = vpop.f32.mrf.mxu0 }
 0x1e6   :  { %v3806_v54 = vadd.f32 %v3687_v3, %v1694_v2 }
 0x1e8   :  { %v2516_v9 = vmul.f32 -1.442695, %v3806_v54  ;;  %v2723_v40 = vpop.eup %2722 }
 0x1e9   :  { %v3819_v23 = vpop.eup %2724  ;;  %v3824_v8 = vadd.f32 1.0, %v2723_v40 }
 0x1ea   :  { %2728 = vpow2.f32 %v2516_v9  ;;  %v3821_v1 = vpop.eup %2726  ;;  %v1940_v16 = vmul.f32 %v3819_v23, %v3803_v24  ;;  %vm1945_vm15 = vweird.f32 %v3819_v23 }
 0x1eb   :  { %v1955_v62 = vmul.f32 %v3821_v1, %v3808_v12  ;;  %vm1960_vm0 = vweird.f32 %v3821_v1  ;;  %vm3874_vm2 = vmor %vm1944_vm1, %vm1945_vm15  ;;  %vm1989_vm12 = vweird.f32 %v3824_v8 }
 0x1ec   :  { %v1941_v31 = vsub.f32 1.0, %v1940_v16  ;;  %vm3884_vm4 = vmor %vm1959_vm3, %vm1960_vm0 }
 0x1ed   :  { %v1696_v50 = vpop.f32.mrf.mxu0  ;;  %v1956_v13 = vsub.f32 1.0, %v1955_v62 }
 0x1ee   :  { %v3814_v0 = vadd.f32 %v3687_v3, %v1696_v50  ;;  %v1942_v36 = vmul.f32 %v3819_v23, %v1941_v31 }
 0x1ef   :  { %v1957_v51 = vmul.f32 %v3821_v1, %v1956_v13 }
 0x1f0   :  { %v2517_v7 = vmul.f32 -1.442695, %v3814_v0  ;;  %v2729_v57 = vpop.eup %2728  ;;  %v1943_v38 = vadd.f32 %v3819_v23, %v1942_v36  ;;  %v1980_v36 = vand.u32 2147483648, %v3817_v25 }
 0x1f1   :  { %v3838_v55 = vadd.f32 1.0, %v2729_v57  ;;  %v1958_v22 = vadd.f32 %v3821_v1, %v1957_v51 }
 0x1f2   :  { %2730 = vpow2.f32 %v2517_v7  ;;  %v1947_v53 = vsel %vm3874_vm2, %v3819_v23, %v1943_v38  ;;  %v1951_v7 = vor.u32 1.1754944e-38, %v1950_v26  ;;  %v1966_v23 = vor.u32 1.1754944e-38, %v1965_v30 }
 0x1f3   :  { %2732 = vrcp.f32 %v3817_v25  ;;  %v1962_v12 = vsel %vm3884_vm4, %v3821_v1, %v1958_v22  ;;  %vm2004_vm15 = vweird.f32 %v3838_v55 }
 0x1f4   :  { %2734 = vrcp.f32 %v3824_v8  ;;  %v1952_v62 = vsel %vm1949_vm5, %v1951_v7, %v1947_v53  ;;  %v1967_v1 = vsel %vm1964_vm6, %v1966_v23, %v1962_v12  ;;  %v2008_v23 = vand.u32 2147483647, %v3838_v55 }
 0x1f5   :  { %v1699_v56 = vpop.f32.mrf.mxu0  ;;  %v2100_v38 = vmul.f32 %v1967_v1, %v3782_v35  ;;  %v1981_v35 = vor.u32 1.1754944e-38, %v1980_v36 }
 0x1f6   :  { %v3829_v14 = vadd.f32 %v3687_v3, %v1699_v56  ;;  %vm2009_vm5 = vcmp.eq.f32.partialorder %v2008_v23, 8.507059e+37 }
 0x1f8   :  { %v2518_v61 = vmul.f32 -1.442695, %v3829_v14  ;;  %v2731_v52 = vpop.eup %2730 }
 0x1f9   :  { %v3840_v33 = vpop.eup %2732  ;;  %v3842_v17 = vadd.f32 1.0, %v2731_v52 }
 0x1fa   :  { %2736 = vpow2.f32 %v2518_v61  ;;  %v1970_v15 = vmul.f32 %v3840_v33, %v3817_v25  ;;  %v3851_v18 = vpop.eup %2734  ;;  %v1978_v61 = vand.u32 2147483647, %v3817_v25  ;;  %vm1975_vm7 = vweird.f32 %v3840_v33 }
 0x1fb   :  { %2738 = vrcp.f32 %v3838_v55  ;;  %v1985_v43 = vmul.f32 %v3851_v18, %v3824_v8  ;;  %vm3919_vm9 = vmor %vm1974_vm8, %vm1975_vm7  ;;  %vm1990_vm10 = vweird.f32 %v3851_v18  ;;  %vm2019_vm3 = vweird.f32 %v3842_v17 }
 0x1fc   :  { %2740 = vrcp.f32 %v3842_v17  ;;  %v1971_v59 = vsub.f32 1.0, %v1970_v15  ;;  %vm1979_vm11 = vcmp.eq.f32.partialorder %v1978_v61, 8.507059e+37  ;;  %vm3945_vm14 = vmor %vm1989_vm12, %vm1990_vm10 }
 0x1fd   :  { %v1701_v4 = vpop.f32.mrf.mxu0  ;;  %v1986_v9 = vsub.f32 1.0, %v1985_v43  ;;  %v1995_v43 = vand.u32 2147483648, %v3824_v8 }
 0x1fe   :  { %v3849_v47 = vadd.f32 %v3687_v3, %v1701_v4  ;;  %v1972_v50 = vmul.f32 %v3840_v33, %v1971_v59  ;;  %v2578_v4 = vld [vmem:[%s4062_s3 + $0x10] sm:$0xff] }
 0x1ff   :  { %v1987_v13 = vmul.f32 %v3851_v18, %v1986_v9  ;;  %2305 = vmatpush.bf16.msra.mxu1 %v2578_v4  ;;  %v1996_v9 = vor.u32 1.1754944e-38, %v1995_v43 }
 0x200   :  { %v2737_v39 = vpop.eup %2736  ;;  %v2519_v32 = vmul.f32 -1.442695, %v3849_v47  ;;  %v1973_v31 = vadd.f32 %v3840_v33, %v1972_v50 }
 0x201   :  { %v3857_v27 = vadd.f32 1.0, %v2737_v39  ;;  %v3866_v6 = vpop.eup %2738  ;;  %v2099_v39 = vmul.f32 %v1952_v62, %v3779_v28  ;;  %v1988_v25 = vadd.f32 %v3851_v18, %v1987_v13  ;;  %v2025_v13 = vand.u32 2147483648, %v3842_v17 }
 0x202   :  { %2742 = vpow2.f32 %v2519_v32  ;;  %v3879_v48 = vpop.eup %2740  ;;  %v2000_v40 = vmul.f32 %v3866_v6, %v3838_v55  ;;  %v1993_v32 = vand.u32 2147483647, %v3824_v8  ;;  %v1977_v28 = vsel %vm3919_vm9, %v3840_v33, %v1973_v31 }
 0x203   :  { %2744 = vrcp.f32 %v3857_v27  ;;  %v2015_v21 = vmul.f32 %v3879_v48, %v3842_v17  ;;  %v3934_v2 = vmul.f32 %v3709_v41, %v2099_v39  ;;  %v1982_v24 = vsel %vm1979_vm11, %v1981_v35, %v1977_v28 }
 0x204   :  { %v2001_v15 = vsub.f32 1.0, %v2000_v40  ;;  %vm3937_vm13 = vcmp.eq.f32.partialorder %v1993_v32, 8.507059e+37  ;;  %v1992_v8 = vsel %vm3945_vm14, %v3851_v18, %v1988_v25  ;;  %vm2005_vm0 = vweird.f32 %v3866_v6 }
 0x205   :  { %v1704_v11 = vpop.f32.mrf.mxu0  ;;  %v2016_v26 = vsub.f32 1.0, %v2015_v21  ;;  %v2023_v18 = vand.u32 2147483647, %v3842_v17  ;;  %v1997_v61 = vsel %vm3937_vm13, %v1996_v9, %v1992_v8  ;;  %vm2020_vm1 = vweird.f32 %v3879_v48  ;;  %vm3972_vm2 = vmor %vm2004_vm15, %vm2005_vm0 }
 0x206   :  { %v3890_v58 = vadd.f32 %v3687_v3, %v1704_v11  ;;  %v2002_v19 = vmul.f32 %v3866_v6, %v2001_v15  ;;  %v2101_v1 = vmul.f32 %v1982_v24, %v3794_v45  ;;  %v2040_v45 = vand.u32 2147483648, %v3857_v27  ;;  %vm3988_vm6 = vmor %vm2019_vm3, %vm2020_vm1 }
 0x207   :  { %v2017_v41 = vmul.f32 %v3879_v48, %v2016_v26  ;;  %vm2024_vm7 = vcmp.eq.f32.partialorder %v2023_v18, 8.507059e+37  ;;  %vm2034_vm8 = vweird.f32 %v3857_v27  ;;  %v2038_v32 = vand.u32 2147483647, %v3857_v27 }
 0x208   :  { %v2743_v56 = vpop.eup %2742  ;;  %v2520_v16 = vmul.f32 -1.442695, %v3890_v58  ;;  %v2026_v59 = vor.u32 1.1754944e-38, %v2025_v13  ;;  %v2041_v28 = vor.u32 1.1754944e-38, %v2040_v45  ;;  %v2181_v11 = vmul.f32 %v3725_v44, %v2101_v1  ;;  %v2576_v44 = vld [vmem:[%s4062_s3] sm:$0xff] }
 0x209   :  { %v3898_v57 = vpop.eup %2744  ;;  %v3903_v52 = vadd.f32 1.0, %v2743_v56  ;;  %v2018_v21 = vadd.f32 %v3879_v48, %v2017_v41  ;;  %vm2039_vm12 = vcmp.eq.f32.partialorder %v2038_v32, 8.507059e+37 }
 0x20a   :  { %v2030_v51 = vmul.f32 %v3898_v57, %v3857_v27  ;;  %vm2035_vm4 = vweird.f32 %v3898_v57 }
 0x20b   :  { %2746 = vrcp.f32 %v3903_v52  ;;  %vm3999_vm9 = vmor %vm2034_vm8, %vm2035_vm4  ;;  %v2055_v27 = vand.u32 2147483648, %v3903_v52  ;;  %vm2049_vm11 = vweird.f32 %v3903_v52  ;;  %v2053_v35 = vand.u32 2147483647, %v3903_v52 }
 0x20c   :  { %2748 = vpow2.f32 %v2520_v16  ;;  %v2031_v30 = vsub.f32 1.0, %v2030_v51  ;;  %v2010_v16 = vand.u32 2147483648, %v3838_v55  ;;  %v2102_v51 = vmul.f32 %v1997_v61, %v3800_v34 }
 0x20d   :  { %v1706_v22 = vpop.f32.mrf.mxu0  ;;  %vm2054_vm14 = vcmp.eq.f32.partialorder %v2053_v35, 8.507059e+37 }
 0x20e   :  { %v3930_v29 = vadd.f32 %v3687_v3, %v1706_v22  ;;  %v2180_v3 = vmul.f32 %v3716_v5, %v2100_v38  ;;  %v2003_v5 = vadd.f32 %v3866_v6, %v2002_v19  ;;  %v2032_v40 = vmul.f32 %v3898_v57, %v2031_v30  ;;  %v2577_v30 = vld [vmem:[%s4062_s3 + $0x8] sm:$0xff]  ;;  %s2810_s3 = smov [#allocation4]  }
 0x20f   :  { %v2011_v39 = vor.u32 1.1754944e-38, %v2010_v16  ;;  %2306 = vmatpush.bf16.msra.mxu1 %v2577_v30  ;;  %s2330_s28 = sshll.u32 %s2810_s3, 4  ;;  %s2331_s28 = int_to_ptr.vmem [resolvable:$true] %s2330_s28 }
 0x210   :  { %v2521_v33 = vmul.f32 -1.442695, %v3930_v29  ;;  %v2007_v36 = vsel %vm3972_vm2, %v3866_v6, %v2003_v5  ;;  %v2033_v15 = vadd.f32 %v3898_v57, %v2032_v40  ;;  %v2022_v6 = vsel %vm3988_vm6, %v3879_v48, %v2018_v21 }
 0x211   :  { %v3942_v53 = vpop.eup %2746  ;;  %v2012_v34 = vsel %vm2009_vm5, %v2011_v39, %v2007_v36  ;;  %v2027_v25 = vsel %vm2024_vm7, %v2026_v59, %v2022_v6  ;;  %v2204_v24 = vadd.f32 %v2180_v3, %v3934_v2  ;;  %vm2221_vm7 = vcmask 1041409  }
 0x212   :  { %v2749_v7 = vpop.eup %2748  ;;  %v2045_v12 = vmul.f32 %v3942_v53, %v3903_v52  ;;  %2750 = vpow2.f32 %v2521_v33  ;;  %vm2050_vm10 = vweird.f32 %v3942_v53  ;;  %v2037_v48 = vsel %vm3999_vm9, %v3898_v57, %v2033_v15 }
 0x213   :  { %v3959_v56 = vadd.f32 1.0, %v2749_v7  ;;  %v2103_v57 = vmul.f32 %v2012_v34, %v3806_v54  ;;  %vm4018_vm13 = vmor %vm2049_vm11, %vm2050_vm10  ;;  %v2042_v50 = vsel %vm2039_vm12, %v2041_v28, %v2037_v48  ;;  %v2182_v54 = vmul.f32 %v3739_v46, %v2102_v51  ;;  %2307 = vmatpush.bf16.msra.mxu1 %v2576_v44 }
 0x214   :  { %v2046_v62 = vsub.f32 1.0, %v2045_v12  ;;  %v2104_v41 = vmul.f32 %v2027_v25, %v3814_v0  ;;  %v2056_v7 = vor.u32 1.1754944e-38, %v2055_v27  ;;  %v2105_v40 = vmul.f32 %v2042_v50, %v3829_v14 }
 0x215   :  { %2752 = vrcp.f32 %v3959_v56  ;;  %v2070_v8 = vand.u32 2147483648, %v3959_v56  ;;  %v2068_v3 = vand.u32 2147483647, %v3959_v56  ;;  %v2183_v5 = vmul.f32 %v3747_v60, %v2103_v57 }
 0x216   :  { %v2047_v4 = vmul.f32 %v3942_v53, %v2046_v62  ;;  %vm2064_vm0 = vweird.f32 %v3959_v56  ;;  %v2198_v0 = vrot.slane %v3796_v63, 4  ;;  %v2184_v62 = vmul.f32 %v3755_v20, %v2104_v41 }
 0x217   :  { %v2071_v61 = vor.u32 1.1754944e-38, %v2070_v8  ;;  %vm2069_vm2 = vcmp.eq.f32.partialorder %v2068_v3, 8.507059e+37  ;;  %v2185_v31 = vmul.f32 %v3763_v10, %v2105_v40 }
 0x218   :  { %v2751_v55 = vpop.eup %2750  ;;  %v2048_v26 = vadd.f32 %v3942_v53, %v2047_v4  ;;  %v2199_v20 = vadd.f32 %v2198_v0, %v3796_v63 }
 0x219   :  { %v3997_v38 = vadd.f32 1.0, %v2751_v55 }
 0x21a   :  { %v2052_v52 = vsel %vm4018_vm13, %v3942_v53, %v2048_v26  ;;  %v2205_v53 = vadd.f32 %v2204_v24, %v2181_v11  ;;  %v2200_v6 = vrot.slane %v2199_v20, 2 }
 0x21b   :  { %v2753_v22 = vpop.eup %2752  ;;  %2754 = vrcp.f32 %v3997_v38  ;;  %v2057_v23 = vsel %vm2054_vm14, %v2056_v7, %v2052_v52  ;;  %v2083_v15 = vand.u32 2147483647, %v3997_v38  ;;  %vm2079_vm4 = vweird.f32 %v3997_v38 }
 0x21c   :  { %v2060_v19 = vmul.f32 %v2753_v22, %v3959_v56  ;;  %vm2065_vm15 = vweird.f32 %v2753_v22  ;;  %v2206_v18 = vadd.f32 %v2205_v53, %v2182_v54  ;;  %v2106_v21 = vmul.f32 %v2057_v23, %v3849_v47 }
 0x21d   :  { %vm2066_vm1 = vmor %vm2064_vm0, %vm2065_vm15  ;;  %v2085_v56 = vand.u32 2147483648, %v3997_v38  ;;  %vm2084_vm6 = vcmp.eq.f32.partialorder %v2083_v15, 8.507059e+37  ;;  %v2201_v43 = vadd.f32 %v2200_v6, %v2199_v20 }
 0x21e   :  { %v2061_v9 = vsub.f32 1.0, %v2060_v19  ;;  %v2207_v14 = vadd.f32 %v2206_v18, %v2183_v5  ;;  %v2186_v47 = vmul.f32 %v3767_v37, %v2106_v21 }
 0x21f   :  { %v2086_v51 = vor.u32 1.1754944e-38, %v2085_v56 }
 0x220   :  { %v2062_v2 = vmul.f32 %v2753_v22, %v2061_v9  ;;  %v2208_v45 = vadd.f32 %v2207_v14, %v2184_v62 }
 0x221   :  { %v2755_v12 = vpop.eup %2754 }
 0x222   :  { %v2063_v16 = vadd.f32 %v2753_v22, %v2062_v2  ;;  %v2075_v46 = vmul.f32 %v2755_v12, %v3997_v38  ;;  %vm2080_vm3 = vweird.f32 %v2755_v12  ;;  %v2209_v10 = vadd.f32 %v2208_v45, %v2185_v31 }
 0x223   :  { %vm2081_vm5 = vmor %vm2079_vm4, %vm2080_vm3 }
 0x224   :  { %v2067_v1 = vsel %vm2066_vm1, %v2753_v22, %v2063_v16  ;;  %v2076_v60 = vsub.f32 1.0, %v2075_v46  ;;  %v2210_v32 = vadd.f32 %v2209_v10, %v2186_v47  ;;  %v2202_v22 = vrot.slane %v2201_v43, 1 }
 0x225   :  { %v2072_v13 = vsel %vm2069_vm2, %v2071_v61, %v2067_v1 }
 0x226   :  { %v2107_v4 = vmul.f32 %v2072_v13, %v3890_v58  ;;  %v2077_v36 = vmul.f32 %v2755_v12, %v2076_v60  ;;  %v2203_v28 = vadd.f32 %v2202_v22, %v2201_v43 }
 0x228   :  { %v2078_v55 = vadd.f32 %v2755_v12, %v2077_v36  ;;  %v2187_v39 = vmul.f32 %v3774_v42, %v2107_v4  ;;  %v2225_v42 = vpack.c.bf16 %v2203_v28, %v2203_v28 }
 0x22a   :  { %v2082_v17 = vsel %vm2081_vm5, %v2755_v12, %v2078_v55  ;;  %v2211_v59 = vadd.f32 %v2210_v32, %v2187_v39  ;;  %v2247_v11 = vunpack.c.l.b16 %v2225_v42 }
 0x22b   :  { %v2087_v58 = vsel %vm2084_vm6, %v2086_v51, %v2082_v17 }
 0x22c   :  { %v2108_v34 = vmul.f32 %v2087_v58, %v3930_v29 }
 0x22e   :  { %v2188_v63 = vmul.f32 %v3784_v49, %v2108_v34  ;;  %v2595_v49 = vld [vmem:[%s4063_s4 + $0x2] ss:$0 sm:$0xff] }
 0x230   :  { %v2212_v37 = vadd.f32 %v2211_v59, %v2188_v63 }
 0x232   :  { %v2213_v26 = vrot.slane %v2212_v37, 4 }
 0x234   :  { %v2214_v38 = vadd.f32 %v2213_v26, %v2212_v37 }
 0x236   :  { %v2215_v48 = vrot.slane %v2214_v38, 2 }
 0x238   :  { %v2216_v27 = vadd.f32 %v2215_v48, %v2214_v38 }
 0x23a   :  { %v2217_v25 = vrot.slane %v2216_v27, 1 }
 0x23c   :  { %v2218_v35 = vadd.f32 %v2217_v25, %v2216_v27 }
 0x23e   :  { %v2226_v19 = vpack.c.bf16 %v2218_v35, %v2218_v35  ;;  %v2222_v30 = vsel %vm2221_vm7, %v2218_v35, %v2203_v28 }
 0x23f   :  { %2224 = vst [vmem:[#allocation4] sm:$0x3] %v2222_v30 }
 0x240   :  { %v2248_v29 = vunpack.c.l.b16 %v2226_v19  ;;  %2335 = dma.vmem_to_hbm [thread:$0]  %s2331_s28, 32, %s2333_s8, [#allocation5]  }
 0x242   :  { %v2249_v57 = vsel %vm2221_vm7, %v2248_v29, %v2247_v11 }
 0x243   :  { %v2250_v33 = vpack.c.b16 %v2249_v57, %v2249_v57 }
 0x245   :  { %2308 = vmatmul.bf16.vlgmr.msra.gmra.mxu1 %v2250_v33 }
 0x2c2   :  { %v2309_v24 = vpop.f32.mrf.mxu1 }
 0x2c3   :  { %v2310_v50 = vadd.f32 %v2595_v49, %v2309_v24 }
 0x2c5   :  { %2313 = vst [vmem:[#allocation2] sm:$0x3] %v2310_v50 }
 0x2c6   :  { %2324 = dma.vmem_to_hbm [thread:$0]  %s2320_s5, 32, %s2322_s14, [#allocation3]  }
 0x2ca   :  { %v2311_v52 = vpop.f32.mrf.mxu1 }
 0x2cb   :  { %2805 = dma.done.wait [#allocation3], 32  }
 0x2cc   :  { %2806 = vsyncadd [#allocation3], 4294967264 }
 0x2cd   :  { %2807 = dma.done.wait [#allocation5], 32  }
 0x2ce   :  { %2808 = vsyncadd [#allocation5], 4294967264 }
 0x2cf   :  { %2344 = vsyncpa [#allocation3], 1 }
 0x2d0   :  { %2345 = vsyncpa [#allocation5], 1 }

</bundles_post_ra>
